<compile_context>
chip_gen: v7x
topology: tpu7x:2x2x1
jax: 0.10.0
libtpu: 0.0.40
codegen_flags: <defaults>
</compile_context>

<pallas_src>
import functools

import jax
import jax.numpy as jnp
from jax.experimental import pallas as pl
from jax.experimental.pallas import tpu as pltpu


def _round_up(n, m):
    return ((n + m - 1) // m) * m


def _zeros_index_map(nd, b):
    return (0,) * nd


# ------------------------------- kernel ------------------------------------ #
def _seres2net_kernel(scale, hid_p, cout, bt, has_shortcut,
                      x_ref, w1_ref, vch_ref, wr_ref, vres_ref,
                      w2_ref, vout_ref, wse1_ref, wse2_ref, vse_ref,
                      *rest):
    if has_shortcut:
        wsc_ref, out_ref, cat_ref = rest
    else:
        out_ref, cat_ref = rest
        wsc_ref = None

    # Coalesced per-channel vectors: slice the columns once (hoisted).
    b1, a1, c1 = vch_ref[:, 0:1], vch_ref[:, 1:2], vch_ref[:, 2:3]
    b2, a2, c2 = vout_ref[:, 0:1], vout_ref[:, 1:2], vout_ref[:, 2:3]
    bse2 = vout_ref[:, 3:4]
    bse1 = vse_ref[:, 0:1]
    bsc = vout_ref[:, 4:5] if has_shortcut else None
    res_vecs = [(vres_ref[:, 3 * i:3 * i + 1],
                 vres_ref[:, 3 * i + 1:3 * i + 2],
                 vres_ref[:, 3 * i + 2:3 * i + 3]) for i in range(scale - 1)]

    w1 = w1_ref[...]
    w2 = w2_ref[...]
    wse1 = wse1_ref[...]
    wse2 = wse2_ref[...]
    wsc = wsc_ref[...] if has_shortcut else None

    for b in range(bt):
        # ---- tdnn1: 1x1 conv (bf16 MXU, f32 acc) -> ReLU -> folded BN ------ #
        xb = x_ref[b].astype(jnp.bfloat16)                          # (Cin, L)
        h = jnp.dot(w1, xb, preferred_element_type=jnp.float32)     # (ch_p, L)
        h = jnp.maximum(h + b1, 0.0) * a1 + c1

        # ---- Res2Net chain; chunks are sublane-aligned views of h --------- #
        # Each y_i is written to the VMEM concat scratch at its chunk slot.
        y_prev = None
        for i in range(scale):
            x_i = h[i * hid_p:(i + 1) * hid_p, :]
            if i == 0:
                y_i = x_i
            else:
                inp = x_i if i == 1 else x_i + y_prev
                z = jnp.dot(wr_ref[i - 1], inp.astype(jnp.bfloat16),
                            preferred_element_type=jnp.float32)
                br_i, ar_i, cr_i = res_vecs[i - 1]
                y_i = jnp.maximum(z + br_i, 0.0) * ar_i + cr_i
            cat_ref[i * hid_p:(i + 1) * hid_p, :] = y_i
            y_prev = y_i

        # ---- tdnn2: ONE dense matmul over the concatenated chunks --------- #
        h2 = jnp.dot(w2, cat_ref[...].astype(jnp.bfloat16),
                     preferred_element_type=jnp.float32)            # (cout_p, L)
        h2 = jnp.maximum(h2 + b2, 0.0) * a2 + c2

        # ---- SE block (lengths=None path) ---------------------------------- #
        # TODO(synk): lengths-based masked temporal mean not implemented.
        s = jnp.mean(h2, axis=-1, keepdims=True)                    # (cout_p, 1)
        s = jnp.broadcast_to(s, h2.shape)                           # keep dots N=L
        s1 = jnp.maximum(
            jnp.dot(wse1, s.astype(jnp.bfloat16),
                    preferred_element_type=jnp.float32) + bse1, 0.0)
        g = jax.nn.sigmoid(
            jnp.dot(wse2, s1.astype(jnp.bfloat16),
                    preferred_element_type=jnp.float32) + bse2)     # (cout_p, L)
        gated = h2 * g

        # ---- residual last; re-read x_ref so no activation copy stays live - #
        if has_shortcut:
            res = jnp.dot(wsc, x_ref[b],
                          preferred_element_type=jnp.float32) + bsc
            out_b = (gated + res)[:cout, :]
        else:
            # Cin == Cout: exact pass-through, no identity matmul.
            out_b = gated[:cout, :] + x_ref[b]
        out_ref[b] = out_b.astype(out_ref.dtype)


# --------------------------- parameter packing ------------------------------ #
def pack_params(p, scale):
    """Pack weights for the channels-on-sublanes kernel layout."""
    Cout, Cin = p["W1"].shape
    se_ch = p["Wse1"].shape[0]
    assert Cout % scale == 0
    hid = Cout // scale
    hid_p = _round_up(hid, 8)            # sublane-aligned chunk slots
    ch_p = scale * hid_p                 # chunk-padded tdnn1 output channels
    cout_p = _round_up(Cout, 8)
    cse_p = _round_up(se_ch, 8)

    def pad_rows(w, r):
        return jnp.pad(w, ((0, r - w.shape[0]),) + ((0, 0),) * (w.ndim - 1))

    def chunk_pad_rows(w):               # (Cout, ...) -> (ch_p, ...) by chunk
        w = w.reshape((scale, hid) + w.shape[1:])
        w = jnp.pad(w, ((0, 0), (0, hid_p - hid)) + ((0, 0),) * (w.ndim - 2))
        return w.reshape((ch_p,) + w.shape[2:])

    def padvec(v, r):
        return jnp.pad(v, (0, r - v.shape[0]))

    has_shortcut = p.get("Wsc") is not None

    # tdnn1
    w1 = chunk_pad_rows(p["W1"]).astype(jnp.bfloat16)               # (ch_p, Cin)
    vch = jnp.stack([chunk_pad_rows(p["b1"]), chunk_pad_rows(p["a1"]),
                     chunk_pad_rows(p["c1"])], axis=1)              # (ch_p, 3)
    # Res2Net blocks
    wr = jnp.pad(p["Wr"], ((0, 0), (0, hid_p - hid), (0, hid_p - hid))
                 ).astype(jnp.bfloat16)                             # (s-1, hid_p, hid_p)
    res_cols = []
    for i in range(scale - 1):
        for v in (p["br"][i], p["ar"][i], p["cr"][i]):
            res_cols.append(padvec(v, hid_p))
    vres = jnp.stack(res_cols, axis=1)                              # (hid_p, 3(s-1))
    # tdnn2: chunk-pad its *input* (column) dim, pad output rows
    w2 = chunk_pad_rows(p["W2"].T).T                                # (Cout, ch_p)
    w2 = pad_rows(w2, cout_p).astype(jnp.bfloat16)                  # (cout_p, ch_p)
    vout_cols = [padvec(p["b2"], cout_p), padvec(p["a2"], cout_p),
                 padvec(p["c2"], cout_p), padvec(p["bse2"], cout_p)]
    if has_shortcut:
        vout_cols.append(padvec(p["bsc"], cout_p))
    vout = jnp.stack(vout_cols, axis=1)                             # (cout_p, 4|5)
    # SE block
    wse1 = pad_rows(jnp.pad(p["Wse1"], ((0, 0), (0, cout_p - Cout))), cse_p
                    ).astype(jnp.bfloat16)                          # (cse_p, cout_p)
    wse2 = pad_rows(jnp.pad(p["Wse2"], ((0, 0), (0, cse_p - se_ch))), cout_p
                    ).astype(jnp.bfloat16)                          # (cout_p, cse_p)
    vse = padvec(p["bse1"], cse_p).reshape(cse_p, 1)

    args = [w1, vch, wr, vres, w2, vout, wse1, wse2, vse]
    if has_shortcut:
        # Shortcut conv adds straight into the output -> keep it in f32.
        args.append(pad_rows(p["Wsc"], cout_p).astype(jnp.float32))

    meta = dict(has_shortcut=has_shortcut, Cin=Cin, Cout=Cout, hid=hid,
                hid_p=hid_p, ch_p=ch_p, cout_p=cout_p, cse_p=cse_p)
    return args, meta


# ------------------------------- wrapper ------------------------------------ #
def _vmem_limit_bytes():
    try:
        cap = pltpu.get_tpu_info().vmem_capacity_bytes
    except Exception:
        cap = 64 * 1024 * 1024           # conservative fallback
    return max(int(cap * 3 // 4), 16 * 1024 * 1024)


def _pick_batch_tile(B, Cin, Cout, ch_p, L, param_bytes, vmem_limit):
    """Pick batch elements per grid step: amortize per-step overhead while
    fitting a VMEM budget (params, concat scratch, in-kernel temporaries and
    the double-buffered x/out blocks) and keeping >=2 grid steps when B >= 2
    so both v7x TensorCores get sharded work."""
    budget = int(vmem_limit * 0.6)
    fixed = (2 * param_bytes                     # params (double-buffered)
             + ch_p * L * 4                      # concat scratch
             + (ch_p + 4 * Cout + Cin) * L * 4)  # per-element f32 temporaries
    best = 1
    for bt in range(1, B + 1):
        if B % bt:
            continue
        if B >= 2 and bt > max(1, B // 2):
            break
        need = fixed + 2 * bt * (Cin + Cout) * L * 4   # double-buffered blocks
        if need > budget:
            break
        best = bt
        if bt * (Cin + Cout) * L * 4 >= 4 * 1024 * 1024:
            break                                      # big enough per step
    return best


def seres2net_forward(x_bcl, params, scale, out_dtype=jnp.float32):
    """x_bcl: (B, Cin, L) in PyTorch Conv1d layout. Returns (B, Cout, L).

    The kernel reads the native layout directly (channels on sublanes, time on
    lanes): no wrapper-side transpose / pad / slice HBM round trips."""
    assert scale >= 2
    args, meta = pack_params(params, scale)
    B, Cin, L = x_bcl.shape
    Cout, hid = meta["Cout"], meta["hid"]

    param_bytes = sum(int(a.size) * a.dtype.itemsize for a in args)
    vmem_limit = _vmem_limit_bytes()
    bt = _pick_batch_tile(B, Cin, Cout, meta["ch_p"], L, param_bytes, vmem_limit)

    in_specs = [pl.BlockSpec((bt, Cin, L), lambda b: (b, 0, 0))]
    for a in args:
        in_specs.append(pl.BlockSpec(a.shape,
                                     functools.partial(_zeros_index_map, a.ndim)))
    out_spec = pl.BlockSpec((bt, Cout, L), lambda b: (b, 0, 0))

    flops = 2 * B * L * (Cout * Cin + (scale - 1) * hid * hid + Cout * Cout
                         + 2 * meta["cse_p"] * Cout
                         + (Cout * Cin if meta["has_shortcut"] else 0))
    cost = pl.CostEstimate(flops=int(flops),
                           transcendentals=int(B * L * Cout),
                           bytes_accessed=int(B * L * (Cin + Cout) * 4 + param_bytes))

    kernel = functools.partial(_seres2net_kernel, scale, meta["hid_p"], Cout, bt,
                               meta["has_shortcut"])
    out = pl.pallas_call(
        kernel,
        out_shape=jax.ShapeDtypeStruct((B, Cout, L), out_dtype),
        grid=(B // bt,),
        in_specs=in_specs,
        out_specs=out_spec,
        scratch_shapes=[pltpu.VMEM((meta["ch_p"], L), jnp.float32)],
        compiler_params=pltpu.CompilerParams(
            dimension_semantics=("parallel",),
            vmem_limit_bytes=vmem_limit),
        cost_estimate=cost,
    )(x_bcl, *args)
    return out


# --------------------------- parameter setup -------------------------------- #
def make_params(key, Cin, Cout, se_ch, scale, eps=1e-5):
    hid = Cout // scale
    keys = iter(jax.random.split(key, 64))

    def conv(cin, cout):
        bound = 1.0 / (cin ** 0.5)            # PyTorch Conv1d default init (k=1)
        W = jax.random.uniform(next(keys), (cout, cin), jnp.float32, -bound, bound)
        b = jax.random.uniform(next(keys), (cout,), jnp.float32, -bound, bound)
        return W, b

    def bn_affine(c):
        gamma = 1.0 + 0.1 * jax.random.normal(next(keys), (c,), jnp.float32)
        beta = 0.1 * jax.random.normal(next(keys), (c,), jnp.float32)
        rmean = 0.1 * jax.random.normal(next(keys), (c,), jnp.float32)
        rvar = jax.random.uniform(next(keys), (c,), jnp.float32, 0.5, 1.5)
        a = gamma / jnp.sqrt(rvar + eps)
        return a, beta - rmean * a

    p = {}
    if Cin != Cout:
        p["Wsc"], p["bsc"] = conv(Cin, Cout)
    else:
        p["Wsc"], p["bsc"] = None, None       # residual is an exact pass-through
    p["W1"], p["b1"] = conv(Cin, Cout)
    p["a1"], p["c1"] = bn_affine(Cout)
    Wr, br, ar, cr = [], [], [], []
    for _ in range(scale - 1):
        W, b = conv(hid, hid)
        a, c = bn_affine(hid)
        Wr.append(W); br.append(b); ar.append(a); cr.append(c)
    p["Wr"], p["br"] = jnp.stack(Wr), jnp.stack(br)
    p["ar"], p["cr"] = jnp.stack(ar), jnp.stack(cr)
    p["W2"], p["b2"] = conv(Cout, Cout)
    p["a2"], p["c2"] = bn_affine(Cout)
    p["Wse1"], p["bse1"] = conv(Cout, se_ch)
    p["Wse2"], p["bse2"] = conv(se_ch, Cout)
    return p


# --------------------------- pure-JAX reference ----------------------------- #
def reference_forward(x_bcl, p, scale):
    x = jnp.transpose(x_bcl, (0, 2, 1))       # (B, L, Cin)

    def mm(a, w_t):                            # bf16 operands, f32 acc (matches kernel)
        return jnp.dot(a.astype(jnp.bfloat16), w_t.astype(jnp.bfloat16),
                       preferred_element_type=jnp.float32)

    h = jnp.maximum(mm(x, p["W1"].T) + p["b1"], 0.0) * p["a1"] + p["c1"]
    hid = h.shape[-1] // scale
    ys, y_prev = [], None
    for i in range(scale):
        x_i = h[..., i * hid:(i + 1) * hid]
        if i == 0:
            y_i = x_i
        else:
            inp = x_i if i == 1 else x_i + y_prev
            z = mm(inp, p["Wr"][i - 1].T) + p["br"][i - 1]
            y_i = jnp.maximum(z, 0.0) * p["ar"][i - 1] + p["cr"][i - 1]
        ys.append(y_i)
        y_prev = y_i
    h = jnp.concatenate(ys, axis=-1)
    h = jnp.maximum(mm(h, p["W2"].T) + p["b2"], 0.0) * p["a2"] + p["c2"]
    s = jnp.mean(h, axis=1, keepdims=True)
    s = jnp.maximum(mm(s, p["Wse1"].T) + p["bse1"], 0.0)
    g = jax.nn.sigmoid(mm(s, p["Wse2"].T) + p["bse2"])
    if p.get("Wsc") is not None:
        residual = jnp.dot(x, p["Wsc"].T, preferred_element_type=jnp.float32,
                           precision=jax.lax.Precision.HIGHEST) + p["bsc"]
    else:
        residual = x
    return jnp.transpose(h * g + residual, (0, 2, 1))


# --------------------------------- main ------------------------------------- #
if __name__ == "__main__":
    key = jax.random.PRNGKey(0)
    configs = [
        # (B, Cin, Cout, L, scale, se_ch)
        (2, 32, 64, 16, 8, 16),   # Cin != Cout -> shortcut 1x1 conv path
        (2, 64, 64, 16, 8, 16),   # Cin == Cout -> exact residual pass-through
    ]
    for (B, Cin, Cout, L, scale, se_ch) in configs:
        key, kx, kp = jax.random.split(key, 3)
        x = jax.random.normal(kx, (B, Cin, L), jnp.float32)   # PyTorch (B, C, L)
        params = make_params(kp, Cin, Cout, se_ch, scale)

        out = jax.block_until_ready(seres2net_forward(x, params, scale))
        ref = reference_forward(x, params, scale)

        assert out.shape == (B, Cout, L)
        if not jnp.allclose(out, ref, atol=3e-3, rtol=3e-3):
            err = float(jnp.max(jnp.abs(out - ref)))
            raise AssertionError(f"Pallas kernel mismatch (max abs err {err:.3e})")

    print("KERNEL_OK")
</pallas_src>

<mosaic_0001>
module attributes {stable_mosaic.version = 11 : i64} {
  func.func @_seres2net_kernel(%arg0: i32, %arg1: memref<1x32x16xf32, #tpu.memory_space<vmem>>, %arg2: memref<64x32xbf16, #tpu.memory_space<vmem>>, %arg3: memref<64x3xf32, #tpu.memory_space<vmem>>, %arg4: memref<7x8x8xbf16, #tpu.memory_space<vmem>>, %arg5: memref<8x21xf32, #tpu.memory_space<vmem>>, %arg6: memref<64x64xbf16, #tpu.memory_space<vmem>>, %arg7: memref<64x5xf32, #tpu.memory_space<vmem>>, %arg8: memref<16x64xbf16, #tpu.memory_space<vmem>>, %arg9: memref<64x16xbf16, #tpu.memory_space<vmem>>, %arg10: memref<16x1xf32, #tpu.memory_space<vmem>>, %arg11: memref<64x32xf32, #tpu.memory_space<vmem>>, %arg12: memref<1x64x16xf32, #tpu.memory_space<vmem>>, %arg13: memref<64x16xf32, #tpu.memory_space<vmem>>) attributes {dimension_semantics = [#tpu.dimension_semantics<parallel>], iteration_bounds = array<i64: 2>, scalar_prefetch = 0 : i64, scratch_operands = 1 : i64, tpu.core_type = #tpu.core_type<tc>, window_params = [{transform_indices = @transform_0, window_bounds = array<i64: 1, 32, 16>}, {pipeline_mode = #tpu.pipeline_mode<synchronous>, transform_indices = @transform_1, window_bounds = array<i64: 64, 32>}, {pipeline_mode = #tpu.pipeline_mode<synchronous>, transform_indices = @transform_2, window_bounds = array<i64: 64, 3>}, {pipeline_mode = #tpu.pipeline_mode<synchronous>, transform_indices = @transform_3, window_bounds = array<i64: 7, 8, 8>}, {pipeline_mode = #tpu.pipeline_mode<synchronous>, transform_indices = @transform_4, window_bounds = array<i64: 8, 21>}, {pipeline_mode = #tpu.pipeline_mode<synchronous>, transform_indices = @transform_5, window_bounds = array<i64: 64, 64>}, {pipeline_mode = #tpu.pipeline_mode<synchronous>, transform_indices = @transform_6, window_bounds = array<i64: 64, 5>}, {pipeline_mode = #tpu.pipeline_mode<synchronous>, transform_indices = @transform_7, window_bounds = array<i64: 16, 64>}, {pipeline_mode = #tpu.pipeline_mode<synchronous>, transform_indices = @transform_8, window_bounds = array<i64: 64, 16>}, {pipeline_mode = #tpu.pipeline_mode<synchronous>, transform_indices = @transform_9, window_bounds = array<i64: 16, 1>}, {pipeline_mode = #tpu.pipeline_mode<synchronous>, transform_indices = @transform_10, window_bounds = array<i64: 64, 32>}, {transform_indices = @transform_11, window_bounds = array<i64: 1, 64, 16>}]} {
    %c0 = arith.constant 0 : index
    %c0_0 = arith.constant 0 : index
    %0 = vector.load %arg3[%c0, %c0_0] : memref<64x3xf32, #tpu.memory_space<vmem>>, vector<64x1xf32>
    %c0_1 = arith.constant 0 : index
    %c1 = arith.constant 1 : index
    %1 = vector.load %arg3[%c0_1, %c1] : memref<64x3xf32, #tpu.memory_space<vmem>>, vector<64x1xf32>
    %c0_2 = arith.constant 0 : index
    %c2 = arith.constant 2 : index
    %2 = vector.load %arg3[%c0_2, %c2] : memref<64x3xf32, #tpu.memory_space<vmem>>, vector<64x1xf32>
    %c0_3 = arith.constant 0 : index
    %c0_4 = arith.constant 0 : index
    %3 = vector.load %arg7[%c0_3, %c0_4] : memref<64x5xf32, #tpu.memory_space<vmem>>, vector<64x1xf32>
    %c0_5 = arith.constant 0 : index
    %c1_6 = arith.constant 1 : index
    %4 = vector.load %arg7[%c0_5, %c1_6] : memref<64x5xf32, #tpu.memory_space<vmem>>, vector<64x1xf32>
    %c0_7 = arith.constant 0 : index
    %c2_8 = arith.constant 2 : index
    %5 = vector.load %arg7[%c0_7, %c2_8] : memref<64x5xf32, #tpu.memory_space<vmem>>, vector<64x1xf32>
    %c0_9 = arith.constant 0 : index
    %c3 = arith.constant 3 : index
    %6 = vector.load %arg7[%c0_9, %c3] : memref<64x5xf32, #tpu.memory_space<vmem>>, vector<64x1xf32>
    %c0_10 = arith.constant 0 : index
    %c0_11 = arith.constant 0 : index
    %7 = vector.load %arg10[%c0_10, %c0_11] : memref<16x1xf32, #tpu.memory_space<vmem>>, vector<16x1xf32>
    %c0_12 = arith.constant 0 : index
    %c4 = arith.constant 4 : index
    %8 = vector.load %arg7[%c0_12, %c4] : memref<64x5xf32, #tpu.memory_space<vmem>>, vector<64x1xf32>
    %c0_13 = arith.constant 0 : index
    %c0_14 = arith.constant 0 : index
    %9 = vector.load %arg5[%c0_13, %c0_14] : memref<8x21xf32, #tpu.memory_space<vmem>>, vector<8x1xf32>
    %c0_15 = arith.constant 0 : index
    %c1_16 = arith.constant 1 : index
    %10 = vector.load %arg5[%c0_15, %c1_16] : memref<8x21xf32, #tpu.memory_space<vmem>>, vector<8x1xf32>
    %c0_17 = arith.constant 0 : index
    %c2_18 = arith.constant 2 : index
    %11 = vector.load %arg5[%c0_17, %c2_18] : memref<8x21xf32, #tpu.memory_space<vmem>>, vector<8x1xf32>
    %c0_19 = arith.constant 0 : index
    %c3_20 = arith.constant 3 : index
    %12 = vector.load %arg5[%c0_19, %c3_20] : memref<8x21xf32, #tpu.memory_space<vmem>>, vector<8x1xf32>
    %c0_21 = arith.constant 0 : index
    %c4_22 = arith.constant 4 : index
    %13 = vector.load %arg5[%c0_21, %c4_22] : memref<8x21xf32, #tpu.memory_space<vmem>>, vector<8x1xf32>
    %c0_23 = arith.constant 0 : index
    %c5 = arith.constant 5 : index
    %14 = vector.load %arg5[%c0_23, %c5] : memref<8x21xf32, #tpu.memory_space<vmem>>, vector<8x1xf32>
    %c0_24 = arith.constant 0 : index
    %c6 = arith.constant 6 : index
    %15 = vector.load %arg5[%c0_24, %c6] : memref<8x21xf32, #tpu.memory_space<vmem>>, vector<8x1xf32>
    %c0_25 = arith.constant 0 : index
    %c7 = arith.constant 7 : index
    %16 = vector.load %arg5[%c0_25, %c7] : memref<8x21xf32, #tpu.memory_space<vmem>>, vector<8x1xf32>
    %c0_26 = arith.constant 0 : index
    %c8 = arith.constant 8 : index
    %17 = vector.load %arg5[%c0_26, %c8] : memref<8x21xf32, #tpu.memory_space<vmem>>, vector<8x1xf32>
    %c0_27 = arith.constant 0 : index
    %c9 = arith.constant 9 : index
    %18 = vector.load %arg5[%c0_27, %c9] : memref<8x21xf32, #tpu.memory_space<vmem>>, vector<8x1xf32>
    %c0_28 = arith.constant 0 : index
    %c10 = arith.constant 10 : index
    %19 = vector.load %arg5[%c0_28, %c10] : memref<8x21xf32, #tpu.memory_space<vmem>>, vector<8x1xf32>
    %c0_29 = arith.constant 0 : index
    %c11 = arith.constant 11 : index
    %20 = vector.load %arg5[%c0_29, %c11] : memref<8x21xf32, #tpu.memory_space<vmem>>, vector<8x1xf32>
    %c0_30 = arith.constant 0 : index
    %c12 = arith.constant 12 : index
    %21 = vector.load %arg5[%c0_30, %c12] : memref<8x21xf32, #tpu.memory_space<vmem>>, vector<8x1xf32>
    %c0_31 = arith.constant 0 : index
    %c13 = arith.constant 13 : index
    %22 = vector.load %arg5[%c0_31, %c13] : memref<8x21xf32, #tpu.memory_space<vmem>>, vector<8x1xf32>
    %c0_32 = arith.constant 0 : index
    %c14 = arith.constant 14 : index
    %23 = vector.load %arg5[%c0_32, %c14] : memref<8x21xf32, #tpu.memory_space<vmem>>, vector<8x1xf32>
    %c0_33 = arith.constant 0 : index
    %c15 = arith.constant 15 : index
    %24 = vector.load %arg5[%c0_33, %c15] : memref<8x21xf32, #tpu.memory_space<vmem>>, vector<8x1xf32>
    %c0_34 = arith.constant 0 : index
    %c16 = arith.constant 16 : index
    %25 = vector.load %arg5[%c0_34, %c16] : memref<8x21xf32, #tpu.memory_space<vmem>>, vector<8x1xf32>
    %c0_35 = arith.constant 0 : index
    %c17 = arith.constant 17 : index
    %26 = vector.load %arg5[%c0_35, %c17] : memref<8x21xf32, #tpu.memory_space<vmem>>, vector<8x1xf32>
    %c0_36 = arith.constant 0 : index
    %c18 = arith.constant 18 : index
    %27 = vector.load %arg5[%c0_36, %c18] : memref<8x21xf32, #tpu.memory_space<vmem>>, vector<8x1xf32>
    %c0_37 = arith.constant 0 : index
    %c19 = arith.constant 19 : index
    %28 = vector.load %arg5[%c0_37, %c19] : memref<8x21xf32, #tpu.memory_space<vmem>>, vector<8x1xf32>
    %c0_38 = arith.constant 0 : index
    %c20 = arith.constant 20 : index
    %29 = vector.load %arg5[%c0_38, %c20] : memref<8x21xf32, #tpu.memory_space<vmem>>, vector<8x1xf32>
    %c0_39 = arith.constant 0 : index
    %c0_40 = arith.constant 0 : index
    %30 = vector.load %arg2[%c0_39, %c0_40] : memref<64x32xbf16, #tpu.memory_space<vmem>>, vector<64x32xbf16>
    %c0_41 = arith.constant 0 : index
    %c0_42 = arith.constant 0 : index
    %31 = vector.load %arg6[%c0_41, %c0_42] : memref<64x64xbf16, #tpu.memory_space<vmem>>, vector<64x64xbf16>
    %c0_43 = arith.constant 0 : index
    %c0_44 = arith.constant 0 : index
    %32 = vector.load %arg8[%c0_43, %c0_44] : memref<16x64xbf16, #tpu.memory_space<vmem>>, vector<16x64xbf16>
    %c0_45 = arith.constant 0 : index
    %c0_46 = arith.constant 0 : index
    %33 = vector.load %arg9[%c0_45, %c0_46] : memref<64x16xbf16, #tpu.memory_space<vmem>>, vector<64x16xbf16>
    %c0_47 = arith.constant 0 : index
    %c0_48 = arith.constant 0 : index
    %34 = vector.load %arg11[%c0_47, %c0_48] : memref<64x32xf32, #tpu.memory_space<vmem>>, vector<64x32xf32>
    %c0_49 = arith.constant 0 : index
    %c0_50 = arith.constant 0 : index
    %c0_51 = arith.constant 0 : index
    %35 = vector.load %arg1[%c0_49, %c0_50, %c0_51] : memref<1x32x16xf32, #tpu.memory_space<vmem>>, vector<1x32x16xf32>
    %36 = vector.shape_cast %35 : vector<1x32x16xf32> to vector<32x16xf32>
    %37 = arith.truncf %36 : vector<32x16xf32> to vector<32x16xbf16>
    %cst = arith.constant dense<0.000000e+00> : vector<64x16xf32>
    %38 = tpu.matmul %30, %37, %cst {dimension_numbers = #tpu.dot_dimension_numbers<[1], [0], [0], [1], [0, 0, 1, 1], [], []>} : vector<64x32xbf16>, vector<32x16xbf16>, vector<64x16xf32> -> vector<64x16xf32>
    %39 = vector.broadcast %0 : vector<64x1xf32> to vector<64x16xf32>
    %40 = arith.addf %38, %39 : vector<64x16xf32>
    %cst_52 = arith.constant 0.000000e+00 : f32
    %41 = vector.broadcast %cst_52 : f32 to vector<64x16xf32>
    %42 = arith.maximumf %40, %41 : vector<64x16xf32>
    %43 = vector.broadcast %1 : vector<64x1xf32> to vector<64x16xf32>
    %44 = arith.mulf %42, %43 : vector<64x16xf32>
    %45 = vector.broadcast %2 : vector<64x1xf32> to vector<64x16xf32>
    %46 = arith.addf %44, %45 : vector<64x16xf32>
    %47 = vector.extract_strided_slice %46 {offsets = [0, 0], sizes = [8, 16], strides = [1, 1]} : vector<64x16xf32> to vector<8x16xf32>
    %c0_53 = arith.constant 0 : index
    %c0_54 = arith.constant 0 : index
    %48 = vector.load %arg13[%c0_53, %c0_54] : memref<64x16xf32, #tpu.memory_space<vmem>>, vector<8x16xf32>
    tpu.vector_store %arg13[%c0_53, %c0_54], %47 {strides = array<i32>} : memref<64x16xf32, #tpu.memory_space<vmem>>, vector<8x16xf32>,
    %49 = vector.extract_strided_slice %46 {offsets = [8, 0], sizes = [8, 16], strides = [1, 1]} : vector<64x16xf32> to vector<8x16xf32>
    %c0_55 = arith.constant 0 : index
    %c0_56 = arith.constant 0 : index
    %c0_57 = arith.constant 0 : index
    %50 = vector.load %arg4[%c0_55, %c0_56, %c0_57] : memref<7x8x8xbf16, #tpu.memory_space<vmem>>, vector<1x8x8xbf16>
    %51 = vector.shape_cast %50 : vector<1x8x8xbf16> to vector<8x8xbf16>
    %52 = arith.truncf %49 : vector<8x16xf32> to vector<8x16xbf16>
    %cst_58 = arith.constant dense<0.000000e+00> : vector<8x16xf32>
    %53 = tpu.matmul %51, %52, %cst_58 {dimension_numbers = #tpu.dot_dimension_numbers<[1], [0], [0], [1], [0, 0, 1, 1], [], []>} : vector<8x8xbf16>, vector<8x16xbf16>, vector<8x16xf32> -> vector<8x16xf32>
    %54 = vector.broadcast %9 : vector<8x1xf32> to vector<8x16xf32>
    %55 = arith.addf %53, %54 : vector<8x16xf32>
    %cst_59 = arith.constant 0.000000e+00 : f32
    %56 = vector.broadcast %cst_59 : f32 to vector<8x16xf32>
    %57 = arith.maximumf %55, %56 : vector<8x16xf32>
    %58 = vector.broadcast %10 : vector<8x1xf32> to vector<8x16xf32>
    %59 = arith.mulf %57, %58 : vector<8x16xf32>
    %60 = vector.broadcast %11 : vector<8x1xf32> to vector<8x16xf32>
    %61 = arith.addf %59, %60 : vector<8x16xf32>
    %c8_60 = arith.constant 8 : index
    %c0_61 = arith.constant 0 : index
    %62 = vector.load %arg13[%c8_60, %c0_61] : memref<64x16xf32, #tpu.memory_space<vmem>>, vector<8x16xf32>
    tpu.vector_store %arg13[%c8_60, %c0_61], %61 {strides = array<i32>} : memref<64x16xf32, #tpu.memory_space<vmem>>, vector<8x16xf32>,
    %63 = vector.extract_strided_slice %46 {offsets = [16, 0], sizes = [8, 16], strides = [1, 1]} : vector<64x16xf32> to vector<8x16xf32>
    %64 = arith.addf %63, %61 : vector<8x16xf32>
    %c1_62 = arith.constant 1 : index
    %c0_63 = arith.constant 0 : index
    %c0_64 = arith.constant 0 : index
    %65 = vector.load %arg4[%c1_62, %c0_63, %c0_64] : memref<7x8x8xbf16, #tpu.memory_space<vmem>>, vector<1x8x8xbf16>
    %66 = vector.shape_cast %65 : vector<1x8x8xbf16> to vector<8x8xbf16>
    %67 = arith.truncf %64 : vector<8x16xf32> to vector<8x16xbf16>
    %cst_65 = arith.constant dense<0.000000e+00> : vector<8x16xf32>
    %68 = tpu.matmul %66, %67, %cst_65 {dimension_numbers = #tpu.dot_dimension_numbers<[1], [0], [0], [1], [0, 0, 1, 1], [], []>} : vector<8x8xbf16>, vector<8x16xbf16>, vector<8x16xf32> -> vector<8x16xf32>
    %69 = vector.broadcast %12 : vector<8x1xf32> to vector<8x16xf32>
    %70 = arith.addf %68, %69 : vector<8x16xf32>
    %cst_66 = arith.constant 0.000000e+00 : f32
    %71 = vector.broadcast %cst_66 : f32 to vector<8x16xf32>
    %72 = arith.maximumf %70, %71 : vector<8x16xf32>
    %73 = vector.broadcast %13 : vector<8x1xf32> to vector<8x16xf32>
    %74 = arith.mulf %72, %73 : vector<8x16xf32>
    %75 = vector.broadcast %14 : vector<8x1xf32> to vector<8x16xf32>
    %76 = arith.addf %74, %75 : vector<8x16xf32>
    %c16_67 = arith.constant 16 : index
    %c0_68 = arith.constant 0 : index
    %77 = vector.load %arg13[%c16_67, %c0_68] : memref<64x16xf32, #tpu.memory_space<vmem>>, vector<8x16xf32>
    tpu.vector_store %arg13[%c16_67, %c0_68], %76 {strides = array<i32>} : memref<64x16xf32, #tpu.memory_space<vmem>>, vector<8x16xf32>,
    %78 = vector.extract_strided_slice %46 {offsets = [24, 0], sizes = [8, 16], strides = [1, 1]} : vector<64x16xf32> to vector<8x16xf32>
    %79 = arith.addf %78, %76 : vector<8x16xf32>
    %c2_69 = arith.constant 2 : index
    %c0_70 = arith.constant 0 : index
    %c0_71 = arith.constant 0 : index
    %80 = vector.load %arg4[%c2_69, %c0_70, %c0_71] : memref<7x8x8xbf16, #tpu.memory_space<vmem>>, vector<1x8x8xbf16>
    %81 = vector.shape_cast %80 : vector<1x8x8xbf16> to vector<8x8xbf16>
    %82 = arith.truncf %79 : vector<8x16xf32> to vector<8x16xbf16>
    %cst_72 = arith.constant dense<0.000000e+00> : vector<8x16xf32>
    %83 = tpu.matmul %81, %82, %cst_72 {dimension_numbers = #tpu.dot_dimension_numbers<[1], [0], [0], [1], [0, 0, 1, 1], [], []>} : vector<8x8xbf16>, vector<8x16xbf16>, vector<8x16xf32> -> vector<8x16xf32>
    %84 = vector.broadcast %15 : vector<8x1xf32> to vector<8x16xf32>
    %85 = arith.addf %83, %84 : vector<8x16xf32>
    %cst_73 = arith.constant 0.000000e+00 : f32
    %86 = vector.broadcast %cst_73 : f32 to vector<8x16xf32>
    %87 = arith.maximumf %85, %86 : vector<8x16xf32>
    %88 = vector.broadcast %16 : vector<8x1xf32> to vector<8x16xf32>
    %89 = arith.mulf %87, %88 : vector<8x16xf32>
    %90 = vector.broadcast %17 : vector<8x1xf32> to vector<8x16xf32>
    %91 = arith.addf %89, %90 : vector<8x16xf32>
    %c24 = arith.constant 24 : index
    %c0_74 = arith.constant 0 : index
    %92 = vector.load %arg13[%c24, %c0_74] : memref<64x16xf32, #tpu.memory_space<vmem>>, vector<8x16xf32>
    tpu.vector_store %arg13[%c24, %c0_74], %91 {strides = array<i32>} : memref<64x16xf32, #tpu.memory_space<vmem>>, vector<8x16xf32>,
    %93 = vector.extract_strided_slice %46 {offsets = [32, 0], sizes = [8, 16], strides = [1, 1]} : vector<64x16xf32> to vector<8x16xf32>
    %94 = arith.addf %93, %91 : vector<8x16xf32>
    %c3_75 = arith.constant 3 : index
    %c0_76 = arith.constant 0 : index
    %c0_77 = arith.constant 0 : index
    %95 = vector.load %arg4[%c3_75, %c0_76, %c0_77] : memref<7x8x8xbf16, #tpu.memory_space<vmem>>, vector<1x8x8xbf16>
    %96 = vector.shape_cast %95 : vector<1x8x8xbf16> to vector<8x8xbf16>
    %97 = arith.truncf %94 : vector<8x16xf32> to vector<8x16xbf16>
    %cst_78 = arith.constant dense<0.000000e+00> : vector<8x16xf32>
    %98 = tpu.matmul %96, %97, %cst_78 {dimension_numbers = #tpu.dot_dimension_numbers<[1], [0], [0], [1], [0, 0, 1, 1], [], []>} : vector<8x8xbf16>, vector<8x16xbf16>, vector<8x16xf32> -> vector<8x16xf32>
    %99 = vector.broadcast %18 : vector<8x1xf32> to vector<8x16xf32>
    %100 = arith.addf %98, %99 : vector<8x16xf32>
    %cst_79 = arith.constant 0.000000e+00 : f32
    %101 = vector.broadcast %cst_79 : f32 to vector<8x16xf32>
    %102 = arith.maximumf %100, %101 : vector<8x16xf32>
    %103 = vector.broadcast %19 : vector<8x1xf32> to vector<8x16xf32>
    %104 = arith.mulf %102, %103 : vector<8x16xf32>
    %105 = vector.broadcast %20 : vector<8x1xf32> to vector<8x16xf32>
    %106 = arith.addf %104, %105 : vector<8x16xf32>
    %c32 = arith.constant 32 : index
    %c0_80 = arith.constant 0 : index
    %107 = vector.load %arg13[%c32, %c0_80] : memref<64x16xf32, #tpu.memory_space<vmem>>, vector<8x16xf32>
    tpu.vector_store %arg13[%c32, %c0_80], %106 {strides = array<i32>} : memref<64x16xf32, #tpu.memory_space<vmem>>, vector<8x16xf32>,
    %108 = vector.extract_strided_slice %46 {offsets = [40, 0], sizes = [8, 16], strides = [1, 1]} : vector<64x16xf32> to vector<8x16xf32>
    %109 = arith.addf %108, %106 : vector<8x16xf32>
    %c4_81 = arith.constant 4 : index
    %c0_82 = arith.constant 0 : index
    %c0_83 = arith.constant 0 : index
    %110 = vector.load %arg4[%c4_81, %c0_82, %c0_83] : memref<7x8x8xbf16, #tpu.memory_space<vmem>>, vector<1x8x8xbf16>
    %111 = vector.shape_cast %110 : vector<1x8x8xbf16> to vector<8x8xbf16>
    %112 = arith.truncf %109 : vector<8x16xf32> to vector<8x16xbf16>
    %cst_84 = arith.constant dense<0.000000e+00> : vector<8x16xf32>
    %113 = tpu.matmul %111, %112, %cst_84 {dimension_numbers = #tpu.dot_dimension_numbers<[1], [0], [0], [1], [0, 0, 1, 1], [], []>} : vector<8x8xbf16>, vector<8x16xbf16>, vector<8x16xf32> -> vector<8x16xf32>
    %114 = vector.broadcast %21 : vector<8x1xf32> to vector<8x16xf32>
    %115 = arith.addf %113, %114 : vector<8x16xf32>
    %cst_85 = arith.constant 0.000000e+00 : f32
    %116 = vector.broadcast %cst_85 : f32 to vector<8x16xf32>
    %117 = arith.maximumf %115, %116 : vector<8x16xf32>
    %118 = vector.broadcast %22 : vector<8x1xf32> to vector<8x16xf32>
    %119 = arith.mulf %117, %118 : vector<8x16xf32>
    %120 = vector.broadcast %23 : vector<8x1xf32> to vector<8x16xf32>
    %121 = arith.addf %119, %120 : vector<8x16xf32>
    %c40 = arith.constant 40 : index
    %c0_86 = arith.constant 0 : index
    %122 = vector.load %arg13[%c40, %c0_86] : memref<64x16xf32, #tpu.memory_space<vmem>>, vector<8x16xf32>
    tpu.vector_store %arg13[%c40, %c0_86], %121 {strides = array<i32>} : memref<64x16xf32, #tpu.memory_space<vmem>>, vector<8x16xf32>,
    %123 = vector.extract_strided_slice %46 {offsets = [48, 0], sizes = [8, 16], strides = [1, 1]} : vector<64x16xf32> to vector<8x16xf32>
    %124 = arith.addf %123, %121 : vector<8x16xf32>
    %c5_87 = arith.constant 5 : index
    %c0_88 = arith.constant 0 : index
    %c0_89 = arith.constant 0 : index
    %125 = vector.load %arg4[%c5_87, %c0_88, %c0_89] : memref<7x8x8xbf16, #tpu.memory_space<vmem>>, vector<1x8x8xbf16>
    %126 = vector.shape_cast %125 : vector<1x8x8xbf16> to vector<8x8xbf16>
    %127 = arith.truncf %124 : vector<8x16xf32> to vector<8x16xbf16>
    %cst_90 = arith.constant dense<0.000000e+00> : vector<8x16xf32>
    %128 = tpu.matmul %126, %127, %cst_90 {dimension_numbers = #tpu.dot_dimension_numbers<[1], [0], [0], [1], [0, 0, 1, 1], [], []>} : vector<8x8xbf16>, vector<8x16xbf16>, vector<8x16xf32> -> vector<8x16xf32>
    %129 = vector.broadcast %24 : vector<8x1xf32> to vector<8x16xf32>
    %130 = arith.addf %128, %129 : vector<8x16xf32>
    %cst_91 = arith.constant 0.000000e+00 : f32
    %131 = vector.broadcast %cst_91 : f32 to vector<8x16xf32>
    %132 = arith.maximumf %130, %131 : vector<8x16xf32>
    %133 = vector.broadcast %25 : vector<8x1xf32> to vector<8x16xf32>
    %134 = arith.mulf %132, %133 : vector<8x16xf32>
    %135 = vector.broadcast %26 : vector<8x1xf32> to vector<8x16xf32>
    %136 = arith.addf %134, %135 : vector<8x16xf32>
    %c48 = arith.constant 48 : index
    %c0_92 = arith.constant 0 : index
    %137 = vector.load %arg13[%c48, %c0_92] : memref<64x16xf32, #tpu.memory_space<vmem>>, vector<8x16xf32>
    tpu.vector_store %arg13[%c48, %c0_92], %136 {strides = array<i32>} : memref<64x16xf32, #tpu.memory_space<vmem>>, vector<8x16xf32>,
    %138 = vector.extract_strided_slice %46 {offsets = [56, 0], sizes = [8, 16], strides = [1, 1]} : vector<64x16xf32> to vector<8x16xf32>
    %139 = arith.addf %138, %136 : vector<8x16xf32>
    %c6_93 = arith.constant 6 : index
    %c0_94 = arith.constant 0 : index
    %c0_95 = arith.constant 0 : index
    %140 = vector.load %arg4[%c6_93, %c0_94, %c0_95] : memref<7x8x8xbf16, #tpu.memory_space<vmem>>, vector<1x8x8xbf16>
    %141 = vector.shape_cast %140 : vector<1x8x8xbf16> to vector<8x8xbf16>
    %142 = arith.truncf %139 : vector<8x16xf32> to vector<8x16xbf16>
    %cst_96 = arith.constant dense<0.000000e+00> : vector<8x16xf32>
    %143 = tpu.matmul %141, %142, %cst_96 {dimension_numbers = #tpu.dot_dimension_numbers<[1], [0], [0], [1], [0, 0, 1, 1], [], []>} : vector<8x8xbf16>, vector<8x16xbf16>, vector<8x16xf32> -> vector<8x16xf32>
    %144 = vector.broadcast %27 : vector<8x1xf32> to vector<8x16xf32>
    %145 = arith.addf %143, %144 : vector<8x16xf32>
    %cst_97 = arith.constant 0.000000e+00 : f32
    %146 = vector.broadcast %cst_97 : f32 to vector<8x16xf32>
    %147 = arith.maximumf %145, %146 : vector<8x16xf32>
    %148 = vector.broadcast %28 : vector<8x1xf32> to vector<8x16xf32>
    %149 = arith.mulf %147, %148 : vector<8x16xf32>
    %150 = vector.broadcast %29 : vector<8x1xf32> to vector<8x16xf32>
    %151 = arith.addf %149, %150 : vector<8x16xf32>
    %c56 = arith.constant 56 : index
    %c0_98 = arith.constant 0 : index
    %152 = vector.load %arg13[%c56, %c0_98] : memref<64x16xf32, #tpu.memory_space<vmem>>, vector<8x16xf32>
    tpu.vector_store %arg13[%c56, %c0_98], %151 {strides = array<i32>} : memref<64x16xf32, #tpu.memory_space<vmem>>, vector<8x16xf32>,
    %c0_99 = arith.constant 0 : index
    %c0_100 = arith.constant 0 : index
    %153 = vector.load %arg13[%c0_99, %c0_100] : memref<64x16xf32, #tpu.memory_space<vmem>>, vector<64x16xf32>
    %154 = arith.truncf %153 : vector<64x16xf32> to vector<64x16xbf16>
    %cst_101 = arith.constant dense<0.000000e+00> : vector<64x16xf32>
    %155 = tpu.matmul %31, %154, %cst_101 {dimension_numbers = #tpu.dot_dimension_numbers<[1], [0], [0], [1], [0, 0, 1, 1], [], []>} : vector<64x64xbf16>, vector<64x16xbf16>, vector<64x16xf32> -> vector<64x16xf32>
    %156 = vector.broadcast %3 : vector<64x1xf32> to vector<64x16xf32>
    %157 = arith.addf %155, %156 : vector<64x16xf32>
    %cst_102 = arith.constant 0.000000e+00 : f32
    %158 = vector.broadcast %cst_102 : f32 to vector<64x16xf32>
    %159 = arith.maximumf %157, %158 : vector<64x16xf32>
    %160 = vector.broadcast %4 : vector<64x1xf32> to vector<64x16xf32>
    %161 = arith.mulf %159, %160 : vector<64x16xf32>
    %162 = vector.broadcast %5 : vector<64x1xf32> to vector<64x16xf32>
    %163 = arith.addf %161, %162 : vector<64x16xf32>
    %cst_103 = arith.constant dense<0.000000e+00> : vector<64xf32>
    %164 = vector.multi_reduction <add>, %163, %cst_103 [1] : vector<64x16xf32> to vector<64xf32>
    %165 = vector.shape_cast %164 : vector<64xf32> to vector<64x1xf32>
    %cst_104 = arith.constant 1.600000e+01 : f32
    %166 = vector.broadcast %cst_104 : f32 to vector<64x1xf32>
    %167 = arith.divf %165, %166 : vector<64x1xf32>
    %168 = vector.shape_cast %167 : vector<64x1xf32> to vector<64x1xf32>
    %169 = vector.broadcast %168 : vector<64x1xf32> to vector<64x16xf32>
    %170 = arith.truncf %169 : vector<64x16xf32> to vector<64x16xbf16>
    %cst_105 = arith.constant dense<0.000000e+00> : vector<16x16xf32>
    %171 = tpu.matmul %32, %170, %cst_105 {dimension_numbers = #tpu.dot_dimension_numbers<[1], [0], [0], [1], [0, 0, 1, 1], [], []>} : vector<16x64xbf16>, vector<64x16xbf16>, vector<16x16xf32> -> vector<16x16xf32>
    %172 = vector.broadcast %7 : vector<16x1xf32> to vector<16x16xf32>
    %173 = arith.addf %171, %172 : vector<16x16xf32>
    %cst_106 = arith.constant 0.000000e+00 : f32
    %174 = vector.broadcast %cst_106 : f32 to vector<16x16xf32>
    %175 = arith.maximumf %173, %174 : vector<16x16xf32>
    %176 = arith.truncf %175 : vector<16x16xf32> to vector<16x16xbf16>
    %cst_107 = arith.constant dense<0.000000e+00> : vector<64x16xf32>
    %177 = tpu.matmul %33, %176, %cst_107 {dimension_numbers = #tpu.dot_dimension_numbers<[1], [0], [0], [1], [0, 0, 1, 1], [], []>} : vector<64x16xbf16>, vector<16x16xbf16>, vector<64x16xf32> -> vector<64x16xf32>
    %178 = vector.broadcast %6 : vector<64x1xf32> to vector<64x16xf32>
    %179 = arith.addf %177, %178 : vector<64x16xf32>
    %180 = arith.negf %179 : vector<64x16xf32>
    %181 = math.exp %180 : vector<64x16xf32>
    %cst_108 = arith.constant 1.000000e+00 : f32
    %182 = vector.broadcast %cst_108 : f32 to vector<64x16xf32>
    %183 = arith.addf %182, %181 : vector<64x16xf32>
    %184 = arith.divf %182, %183 : vector<64x16xf32>
    %185 = arith.mulf %163, %184 : vector<64x16xf32>
    %c0_109 = arith.constant 0 : index
    %c0_110 = arith.constant 0 : index
    %c0_111 = arith.constant 0 : index
    %186 = vector.load %arg1[%c0_109, %c0_110, %c0_111] : memref<1x32x16xf32, #tpu.memory_space<vmem>>, vector<1x32x16xf32>
    %187 = vector.shape_cast %186 : vector<1x32x16xf32> to vector<32x16xf32>
    %cst_112 = arith.constant dense<0.000000e+00> : vector<64x16xf32>
    %188 = tpu.matmul %34, %187, %cst_112 {dimension_numbers = #tpu.dot_dimension_numbers<[1], [0], [0], [1], [0, 0, 1, 1], [], []>} : vector<64x32xf32>, vector<32x16xf32>, vector<64x16xf32> -> vector<64x16xf32>
    %189 = vector.broadcast %8 : vector<64x1xf32> to vector<64x16xf32>
    %190 = arith.addf %188, %189 : vector<64x16xf32>
    %191 = arith.addf %185, %190 : vector<64x16xf32>
    %c0_113 = arith.constant 0 : index
    %c0_114 = arith.constant 0 : index
    %c0_115 = arith.constant 0 : index
    %192 = vector.load %arg12[%c0_113, %c0_114, %c0_115] : memref<1x64x16xf32, #tpu.memory_space<vmem>>, vector<1x64x16xf32>
    %193 = vector.shape_cast %192 : vector<1x64x16xf32> to vector<64x16xf32>
    %194 = vector.shape_cast %191 : vector<64x16xf32> to vector<1x64x16xf32>
    tpu.vector_store %arg12[%c0_113, %c0_114, %c0_115], %194 {strides = array<i32>} : memref<1x64x16xf32, #tpu.memory_space<vmem>>, vector<1x64x16xf32>,
    return
  }
  func.func @transform_0(%arg0: i32) -> (i32, i32, i32) {
    %c0_i32 = arith.constant 0 : i32
    %c0_i32_0 = arith.constant 0 : i32
    %c0_i32_1 = arith.constant 0 : i32
    return %arg0, %c0_i32, %c0_i32_0 : i32, i32, i32
  }
  func.func @transform_1(%arg0: i32) -> (i32, i32) {
    %c0_i32 = arith.constant 0 : i32
    %c0_i32_0 = arith.constant 0 : i32
    %c0_i32_1 = arith.constant 0 : i32
    return %c0_i32, %c0_i32_0 : i32, i32
  }
  func.func @transform_2(%arg0: i32) -> (i32, i32) {
    %c0_i32 = arith.constant 0 : i32
    %c0_i32_0 = arith.constant 0 : i32
    %c0_i32_1 = arith.constant 0 : i32
    return %c0_i32, %c0_i32_0 : i32, i32
  }
  func.func @transform_3(%arg0: i32) -> (i32, i32, i32) {
    %c0_i32 = arith.constant 0 : i32
    %c0_i32_0 = arith.constant 0 : i32
    %c0_i32_1 = arith.constant 0 : i32
    %c0_i32_2 = arith.constant 0 : i32
    return %c0_i32, %c0_i32_0, %c0_i32_1 : i32, i32, i32
  }
  func.func @transform_4(%arg0: i32) -> (i32, i32) {
    %c0_i32 = arith.constant 0 : i32
    %c0_i32_0 = arith.constant 0 : i32
    %c0_i32_1 = arith.constant 0 : i32
    return %c0_i32, %c0_i32_0 : i32, i32
  }
  func.func @transform_5(%arg0: i32) -> (i32, i32) {
    %c0_i32 = arith.constant 0 : i32
    %c0_i32_0 = arith.constant 0 : i32
    %c0_i32_1 = arith.constant 0 : i32
    return %c0_i32, %c0_i32_0 : i32, i32
  }
  func.func @transform_6(%arg0: i32) -> (i32, i32) {
    %c0_i32 = arith.constant 0 : i32
    %c0_i32_0 = arith.constant 0 : i32
    %c0_i32_1 = arith.constant 0 : i32
    return %c0_i32, %c0_i32_0 : i32, i32
  }
  func.func @transform_7(%arg0: i32) -> (i32, i32) {
    %c0_i32 = arith.constant 0 : i32
    %c0_i32_0 = arith.constant 0 : i32
    %c0_i32_1 = arith.constant 0 : i32
    return %c0_i32, %c0_i32_0 : i32, i32
  }
  func.func @transform_8(%arg0: i32) -> (i32, i32) {
    %c0_i32 = arith.constant 0 : i32
    %c0_i32_0 = arith.constant 0 : i32
    %c0_i32_1 = arith.constant 0 : i32
    return %c0_i32, %c0_i32_0 : i32, i32
  }
  func.func @transform_9(%arg0: i32) -> (i32, i32) {
    %c0_i32 = arith.constant 0 : i32
    %c0_i32_0 = arith.constant 0 : i32
    %c0_i32_1 = arith.constant 0 : i32
    return %c0_i32, %c0_i32_0 : i32, i32
  }
  func.func @transform_10(%arg0: i32) -> (i32, i32) {
    %c0_i32 = arith.constant 0 : i32
    %c0_i32_0 = arith.constant 0 : i32
    %c0_i32_1 = arith.constant 0 : i32
    return %c0_i32, %c0_i32_0 : i32, i32
  }
  func.func @transform_11(%arg0: i32) -> (i32, i32, i32) {
    %c0_i32 = arith.constant 0 : i32
    %c0_i32_0 = arith.constant 0 : i32
    %c0_i32_1 = arith.constant 0 : i32
    return %arg0, %c0_i32, %c0_i32_0 : i32, i32, i32
  }
}

</mosaic_0001>

<bundles_post_ra>
// kernel: tpu_custom_call.1
= control target key start
LH: loop header
LB: loop body
LE: loop exit
PB: predicated region body
PF: predicated region fallthrough
CT: control target
= control target key end

     0   :  { %s2363_s17 = smov 0   ;;  %s2917_s0 = inlined_call_operand.vmem [shape: f32[2,32,16], index: 0, kind: input, shape index: {}]   ;;  %s2918_s1 = inlined_call_operand.vmem [shape: bf16[64,32], index: 1, kind: input, shape index: {}]   ;;  %s2919_s2 = inlined_call_operand.vmem [shape: f32[64,3], index: 2, kind: input, shape index: {}]   ;;  %s2920_s3 = inlined_call_operand.vmem [shape: bf16[7,8,8], index: 3, kind: input, shape index: {}]   ;;  %s2921_s4 = inlined_call_operand.vmem [shape: f32[8,21], index: 4, kind: input, shape index: {}]   ;;  %s2922_s5 = inlined_call_operand.vmem [shape: bf16[64,64], index: 5, kind: input, shape index: {}]   ;;  %s2923_s6 = inlined_call_operand.vmem [shape: f32[64,5], index: 6, kind: input, shape index: {}]   ;;  %s2924_s7 = inlined_call_operand.vmem [shape: bf16[16,64], index: 7, kind: input, shape index: {}]   ;;  %s2925_s8 = inlined_call_operand.vmem [shape: bf16[64,16], index: 8, kind: input, shape index: {}]   ;;  %s2926_s9 = inlined_call_operand.vmem [shape: f32[16,1], index: 9, kind: input, shape index: {}]   ;;  %s2927_s10 = inlined_call_operand.vmem [shape: f32[64,32], index: 10, kind: input, shape index: {}]   ;;  %s2928_s11 = inlined_call_operand.vmem [shape: f32[2,64,16], index: 11, kind: output, shape index: {}]  }
   0x1 LB: > { %s1896_s18 = sadd.s32 4294967295, %s2278_s17   ;;  %p1900_p0 = scmp.ge.s32.totalorder %s2278_s17, 1  ;;  %s2278_s17 = sphi %s2363_s17, %s21_s17  }
   0x2   : > { %p337_p1 = scmp.lt.s32.totalorder %s2278_s17, 3 }
   0x4   : > { %p338_p2 = pnand %p1900_p0, %p337_p1 }
   0x5   : > { %v389_v0 = vld [vmem:[%s2919_s2 + $0x8] sm:$0xff] (!%p338_p2)  ;;  %p377_p3 = scmp.lt.s32.totalorder (!%p338_p2), %s1896_s18, 1  ;;  %v2280_v1 = vmov (!%p338_p2), 2   ;;  %v2227_v2 = vld [vmem:[%s2918_s1] sm:$0xff] (!%p338_p2)   ;;  %v2281_v3 = vmov (!%p338_p2), 0   ;;  %vm507_vm0 = vcmask (!%p338_p2), 261120  }
   0x6   : > { %341 = sbr.rel (%p338_p2) target bundleno = 2725 (0xaa5), region = 64  ;;  %2167 = vset.pattern.permute.xlu1 (!%p338_p2), %v2280_v1  ;;  %2165 = vset.pattern.permute.xlu0 (!%p338_p2), %v2281_v3  ;;  %v390_v4 = vld [vmem:[%s2919_s2 + $0x10] sm:$0xff] (!%p338_p2)  ;;  %v2282_v8 = vmov (!%p338_p2), 1   ;;  %v2399_v10 = vld [vmem:[%s2921_s4] sm:$0xff] (!%p338_p2)  ;;  %v2228_v13 = vld [vmem:[%s2918_s1 + $0x8] sm:$0xff] (!%p338_p2)   ;;  %v2283_v14 = vmov (!%p338_p2), 3  }
   0x7   : > { %638 = vperm.xlu1 (!%p338_p2), %2167, %v389_v0   ;;  %454 = vperm.xlu0 (!%p338_p2), %2165, %v389_v0   ;;  %v391_v15 = vld [vmem:[%s2919_s2 + $0x18] sm:$0xff] (!%p338_p2)  ;;  %v2284_v16 = vmov (!%p338_p2), 6   ;;  %v2285_v17 = vmov (!%p338_p2), 4   ;;  %v392_v18 = vld [vmem:[%s2919_s2 + $0x20] sm:$0xff] (!%p338_p2)  ;;  %v2286_v19 = vmov (!%p338_p2), 5   ;;  %v2287_v20 = vmov (!%p338_p2), 9  }
   0x8   : > { %2018 = vmatprep.mubr.msk.bf16.mxu0 (!%p338_p2), %vm507_vm0, %v2227_v2  ;;  %v393_v21 = vld [vmem:[%s2919_s2 + $0x28] sm:$0xff] (!%p338_p2)  ;;  %v2288_v22 = vmov (!%p338_p2), 12   ;;  %v2289_v23 = vmov (!%p338_p2), 7   ;;  %v394_v24 = vld [vmem:[%s2919_s2 + $0x30] sm:$0xff] (!%p338_p2)  ;;  %v2290_v25 = vmov (!%p338_p2), 8   ;;  %v2291_v26 = vmov (!%p338_p2), 15  }
   0x9   : > { %v395_v27 = vld [vmem:[%s2919_s2 + $0x38] sm:$0xff] (!%p338_p2)  ;;  %v388_v28 = vld [vmem:[%s2919_s2] sm:$0xff] (!%p338_p2)  ;;  %v2292_v29 = vmov (!%p338_p2), 10   ;;  %v2293_v30 = vmov (!%p338_p2), 11   ;;  %v2294_v31 = vmov (!%p338_p2), 13   ;;  %v2295_v32 = vmov (!%p338_p2), 14  }
   0xa   : > { %v2296_v33 = vmov (!%p338_p2), 0.0   ;;  %v2297_v34 = vmov (!%p338_p2), 16   ;;  %vm2298_vm1 = vmmov (!%p338_p2), 0   ;;  %v2299_v35 = vmov (!%p338_p2), 17  }
   0xb   : > { %2168 = vset.pattern.permute.xlu1 (!%p338_p2), %v2281_v3  ;;  %2166 = vset.pattern.permute.xlu0 (!%p338_p2), %v2282_v8  ;;  %vm686_vm2 = vcmask (!%p338_p2), 1043456   ;;  %vm682_vm3 = vcmask (!%p338_p2), 64512   ;;  %vm673_vm4 = vcmask (!%p338_p2), 130048   ;;  %vm1210_vm5 = vcmask (!%p338_p2), 523264  }
   0xc   : > { %459 = vperm.xlu1 (!%p338_p2), %2168, %v390_v4   ;;  %598 = vperm.xlu0 (!%p338_p2), %2166, %v389_v0  }
   0xd   : > { %s2930_s18 = smov (!%p377_p3, %s1896_s18), 1  ;;  %2026 = vmatprep.subr.bf16.mxu1 %v2296_v33  ;;  %2028 = vmatprep.mubr.msk.bf16.mxu1 %vm2298_vm1, %v2296_v33 }
   0xe   : > { %s1962_s25 = sshll.u32 %s2930_s18, 5  ;;  %s1963_s19 = sshll.u32 %s2930_s18, 6 }
   0xf   : > { %s2389_s28 = scalar_lea.vmem %s2917_s0, %s1962_s25  ;;  %s2882_s21 = scalar_lea.vmem %s2928_s11, %s1963_s19 }
  0x10   : > { %v441_v5 = vld [vmem:[%s2389_s28] sm:$0xff]  ;;  %v442_v6 = vld [vmem:[%s2389_s28 + $0x8] sm:$0xff]  ;;  %v443_v7 = vld [vmem:[%s2389_s28 + $0x10] sm:$0xff]  ;;  %679 = vperm.xlu1 %2168, %v2399_v10   ;;  %602 = vperm.xlu0 %2166, %v390_v4  }
  0x11   : > { %v445_v9 = vpack.c.bf16 %v442_v6, %v441_v5  ;;  %v444_v11 = vld [vmem:[%s2389_s28 + $0x18] sm:$0xff] }
  0x12   : > { %v446_v12 = vpack.c.bf16 %v444_v11, %v443_v7 }
  0x13   : > { %2014 = vmatprep.subr.bf16.mxu0 %v445_v9 }
  0x14   : > { %2015 = vmatpush3.bf16.msra.mxu0 %v445_v9  ;;  %2169 = vset.pattern.permute.xlu1 %v2282_v8 }
  0x15   : > { %2016 = vmatprep.subr.bf16.mxu0 %v446_v12  ;;  %732 = vperm.xlu1 %2169, %v2399_v10  }
  0x16   : > { %2170 = vset.pattern.permute.xlu0 %v2280_v1 }
  0x17   : > { %642 = vperm.xlu0 %2170, %v390_v4  }
  0x18   : > { %2017 = vmatpush3.bf16.msra.mxu0 %v446_v12 }
  0x19   : > { %2171 = vset.pattern.permute.xlu1 %v2280_v1  ;;  %2044 = vmatprep.subr.bf16.mxu0 %v2296_v33 }
  0x1a   : > { %737 = vperm.xlu1 %2171, %v2399_v10  }
  0x1b   : > { %2019 = vmatmul.mubr.msk.bf16.vlgmr.msra.gmra.mrb[0].mxu0 %vm507_vm0, %v2228_v13  ;;  %2173 = vset.pattern.permute.xlu0 %v2283_v14 }
  0x1c   : > { %747 = vperm.xlu0 %2173, %v2399_v10  }
  0x1e   : > { %2172 = vset.pattern.permute.xlu1 %v2281_v3 }
  0x1f   : > { %464 = vperm.xlu1 %2172, %v391_v15  }
  0x20   : > { %2176 = vset.pattern.permute.xlu0 %v2280_v1 }
  0x21   : > { %646 = vperm.xlu0 %2176, %v391_v15  }
  0x23   : > { %2174 = vset.pattern.permute.xlu1 %v2282_v8 }
  0x24   : > { %606 = vperm.xlu1 %2174, %v391_v15  }
  0x25   : > { %2179 = vset.pattern.permute.xlu0 %v2284_v16 }
  0x26   : > { %813 = vperm.xlu0 %2179, %v2399_v10  }
  0x28   : > { %2175 = vset.pattern.permute.xlu1 %v2285_v17 }
  0x29   : > { %798 = vperm.xlu1 %2175, %v2399_v10  }
  0x2a   : > { %2182 = vset.pattern.permute.xlu0 %v2280_v1 }
  0x2b   : > { %650 = vperm.xlu0 %2182, %v392_v18  }
  0x2d   : > { %2177 = vset.pattern.permute.xlu1 %v2286_v19 }
  0x2e   : > { %803 = vperm.xlu1 %2177, %v2399_v10  }
  0x2f   : > { %2185 = vset.pattern.permute.xlu0 %v2287_v20 }
  0x30   : > { %879 = vperm.xlu0 %2185, %v2399_v10  }
  0x32   : > { %2178 = vset.pattern.permute.xlu1 %v2281_v3 }
  0x33   : > { %469 = vperm.xlu1 %2178, %v392_v18  }
  0x34   : > { %2188 = vset.pattern.permute.xlu0 %v2280_v1 }
  0x35   : > { %654 = vperm.xlu0 %2188, %v393_v21  }
  0x37   : > { %2180 = vset.pattern.permute.xlu1 %v2282_v8 }
  0x38   : > { %610 = vperm.xlu1 %2180, %v392_v18  }
  0x39   : > { %2191 = vset.pattern.permute.xlu0 %v2288_v22 }
  0x3a   : > { %945 = vperm.xlu0 %2191, %v2399_v10  }
  0x3c   : > { %2181 = vset.pattern.permute.xlu1 %v2289_v23 }
  0x3d   : > { %864 = vperm.xlu1 %2181, %v2399_v10  }
  0x3e   : > { %2194 = vset.pattern.permute.xlu0 %v2280_v1 }
  0x3f   : > { %658 = vperm.xlu0 %2194, %v394_v24  }
  0x41   : > { %2183 = vset.pattern.permute.xlu1 %v2290_v25 }
  0x42   : > { %869 = vperm.xlu1 %2183, %v2399_v10  }
  0x43   : > { %2197 = vset.pattern.permute.xlu0 %v2291_v26 }
  0x44   : > { %1011 = vperm.xlu0 %2197, %v2399_v10  }
  0x46   : > { %2184 = vset.pattern.permute.xlu1 %v2281_v3 }
  0x47   : > { %474 = vperm.xlu1 %2184, %v393_v21  }
  0x48   : > { %2200 = vset.pattern.permute.xlu0 %v2280_v1 }
  0x49   : > { %662 = vperm.xlu0 %2200, %v395_v27  }
  0x4b   : > { %2186 = vset.pattern.permute.xlu1 %v2282_v8 }
  0x4c   : > { %614 = vperm.xlu1 %2186, %v393_v21  }
  0x4d   : > { %2203 = vset.pattern.permute.xlu0 %v2282_v8 }
  0x4e   : > { %594 = vperm.xlu0 %2203, %v388_v28  }
  0x50   : > { %2187 = vset.pattern.permute.xlu1 %v2292_v29 }
  0x51   : > { %930 = vperm.xlu1 %2187, %v2399_v10  }
  0x55   : > { %2189 = vset.pattern.permute.xlu1 %v2293_v30 }
  0x56   : > { %935 = vperm.xlu1 %2189, %v2399_v10  }
  0x5a   : > { %2190 = vset.pattern.permute.xlu1 %v2281_v3 }
  0x5b   : > { %479 = vperm.xlu1 %2190, %v394_v24  }
  0x5f   : > { %2192 = vset.pattern.permute.xlu1 %v2282_v8 }
  0x60   : > { %618 = vperm.xlu1 %2192, %v394_v24   ;;  %v675_v24 = vld [vmem:[%s2920_s3] sm:$0xf] }
  0x64   : > { %2193 = vset.pattern.permute.xlu1 %v2294_v31 }
  0x65   : > { %996 = vperm.xlu1 %2193, %v2399_v10  }
  0x69   : > { %2195 = vset.pattern.permute.xlu1 %v2295_v32 }
  0x6a   : > { %1001 = vperm.xlu1 %2195, %v2399_v10  }
  0x6e   : > { %2196 = vset.pattern.permute.xlu1 %v2281_v3 }
  0x6f   : > { %484 = vperm.xlu1 %2196, %v395_v27  }
  0x73   : > { %2198 = vset.pattern.permute.xlu1 %v2282_v8 }
  0x74   : > { %622 = vperm.xlu1 %2198, %v395_v27  }
  0x78   : > { %2199 = vset.pattern.permute.xlu1 %v2297_v34 }
  0x79   : > { %1062 = vperm.xlu1 %2199, %v2399_v10  }
  0x7d   : > { %2201 = vset.pattern.permute.xlu1 %v2299_v35 }
  0x7e   : > { %1067 = vperm.xlu1 %2201, %v2399_v10  }
  0x82   : > { %2202 = vset.pattern.permute.xlu1 %v2281_v3 }
  0x83   : > { %449 = vperm.xlu1 %2202, %v388_v28  }
  0x86   : > { %v639_v36 = vpop.permute.xlu1 %638  ;;  %v455_v45 = vpop.permute.xlu0 %454 }
  0x87   : > { %2204 = vset.pattern.permute.xlu1 %v2280_v1 }
  0x88   : > { %634 = vperm.xlu1 %2204, %v388_v28  }
  0x8b   : > { %v2469_v37 = vpop.permute.xlu1 %459  ;;  %v599_v47 = vpop.permute.xlu0 %598 }
  0x8f   : > { %v2471_v38 = vpop.permute.xlu1 %679  ;;  %v603_v50 = vpop.permute.xlu0 %602 }
  0x94   : > { %v2473_v39 = vpop.permute.xlu1 %732 }
  0x96   : > { %v643_v52 = vpop.permute.xlu0 %642 }
  0x99   : > { %v2475_v40 = vpop.permute.xlu1 %737 }
  0x9b   : > { %v2495_v54 = vpop.permute.xlu0 %747 }
  0x9e   : > { %v2477_v41 = vpop.permute.xlu1 %464 }
  0xa0   : > { %v2499_v56 = vpop.permute.xlu0 %646 }
  0xa3   : > { %v2479_v42 = vpop.permute.xlu1 %606 }
  0xa5   : > { %v2503_v58 = vpop.permute.xlu0 %813 }
  0xa8   : > { %v2481_v43 = vpop.permute.xlu1 %798 }
  0xaa   : > { %v2509_v61 = vpop.permute.xlu0 %650 }
  0xad   : > { %v2483_v44 = vpop.permute.xlu1 %803 }
  0xaf   : > { %v2513_v63 = vpop.permute.xlu0 %879 }
  0xb2   : > { %v2485_v46 = vpop.permute.xlu1 %469 }
  0xb4   : > { %v2517_v2 = vpop.permute.xlu0 %654 }
  0xb7   : > { %v2487_v48 = vpop.permute.xlu1 %610 }
  0xb9   : > { %v2521_v11 = vpop.permute.xlu0 %945 }
  0xbc   : > { %v2489_v49 = vpop.permute.xlu1 %864 }
  0xbe   : > { %v2525_v18 = vpop.permute.xlu0 %658 }
  0xc1   : > { %v2491_v51 = vpop.permute.xlu1 %869 }
  0xc3   : > { %v2535_v25 = vpop.permute.xlu0 %1011 }
  0xc6   : > { %v2493_v53 = vpop.permute.xlu1 %474 }
  0xc8   : > { %v2543_v27 = vpop.permute.xlu0 %662 }
  0xcb   : > { %v2497_v55 = vpop.permute.xlu1 %614 }
  0xcd   : > { %v595_v30 = vpop.permute.xlu0 %594 }
  0xd0   : > { %v2501_v57 = vpop.permute.xlu1 %930 }
  0xd5   : > { %v2505_v59 = vpop.permute.xlu1 %935 }
  0xda   : > { %v2507_v60 = vpop.permute.xlu1 %479 }
  0xdf   : > { %v2511_v62 = vpop.permute.xlu1 %618 }
  0xe4   : > { %v2515_v0 = vpop.permute.xlu1 %996 }
  0xe9   : > { %v2519_v5 = vpop.permute.xlu1 %1001 }
  0xee   : > { %v2020_v4 = vpop.f32.mrb[0].mxu0  ;;  %v2523_v13 = vpop.permute.xlu1 %484 }
  0xef   : > { %v554_v6 = vpop.f32.mrb[1].mxu0 }
  0xf0   : > { %v2021_v7 = vpop.f32.mrb[2].mxu0 }
  0xf1   : > { %v557_v9 = vpop.f32.mrb[3].mxu0 }
  0xf2   : > { %v558_v12 = vadd.f32 %v557_v9, %v455_v45 }
  0xf3   : > { %v2527_v19 = vpop.permute.xlu1 %622 }
  0xf4   : > { %v586_v15 = vmax.f32 %v558_v12, 0.0 }
  0xf6   : > { %v626_v16 = vmul.f32 %v599_v47, %v586_v15 }
  0xf8   : > { %v666_v20 = vadd.f32 %v639_v36, %v626_v16  ;;  %v2530_v23 = vpop.permute.xlu1 %1062  ;;  %v563_v36 = vadd.f32 %v2020_v4, %v2469_v37 }
  0xfa   : > { %v676_v21 = vpack.c.bf16 %v666_v20, %v666_v20  ;;  %v587_v45 = vmax.f32 %v563_v36, 0.0 }
  0xfc   : > { %v688_v22 = vsel %vm686_vm2, %v676_v21, 0  ;;  %v627_v16 = vmul.f32 %v603_v50, %v587_v45  ;;  %v566_v50 = vadd.f32 %v2021_v7, %v2477_v41 }
  0xfd   : > { %2027 = vmatpush3.bf16.msra.mxu1 %v688_v22  ;;  %v2541_v26 = vpop.permute.xlu1 %1067 }
  0xfe   : > { %2032 = vmatprep.subr.bf16.mxu1 %v2296_v33  ;;  %v667_v22 = vadd.f32 %v643_v52, %v627_v16  ;;  %v588_v52 = vmax.f32 %v566_v50, 0.0 }
 0x100   : > { %2029 = vmatmul.mubr.msk.bf16.vlgmr.msra.gmra.mrb[0].mxu1 %vm682_vm3, %v675_v24 }
 0x101   : > { %2034 = vmatprep.mubr.msk.bf16.mxu1 %vm2298_vm1, %v2296_v33 }
 0x102   : > { %v450_v28 = vpop.permute.xlu1 %449 }
 0x103   : > { %v555_v29 = vadd.f32 %v554_v6, %v450_v28 }
 0x105   : > { %v585_v31 = vmax.f32 %v555_v29, 0.0 }
 0x107   : > { %v625_v32 = vmul.f32 %v595_v30, %v585_v31  ;;  %v635_v34 = vpop.permute.xlu1 %634 }
 0x109   : > { %v665_v35 = vadd.f32 %v635_v34, %v625_v32  ;;  %v628_v34 = vmul.f32 %v2479_v42, %v588_v52 }
 0x10b   : > { %674 = vst.msk [vmem:[#allocation2] sm:$0xff] %vm673_vm4, %v665_v35 }
 0x1d3   : > { %v724_v47 = vpop.f32.mrb[0].mxu1 }
 0x1d4   : > { %v725_v9 = vadd.f32 %v724_v47, %v2471_v38  ;;  %v2030_v12 = vpop.f32.mrb[1].mxu1  ;;  %v1914_v38 = vld [vmem:[%s2920_s3 + $0x4] sm:$0xf]  ;;  %v668_v47 = vadd.f32 %v2499_v56, %v628_v34 }
 0x1d5   : > { %v727_v15 = vpop.f32.mrb[2].mxu1 }
 0x1d6   : > { %v730_v20 = vmax.f32 %v725_v9, 0.0  ;;  %v2031_v21 = vpop.f32.mrb[3].mxu1 }
 0x1d8   : > { %v735_v6 = vmul.f32 %v2473_v39, %v730_v20  ;;  %v2229_v39 = vld [vmem:[%s2918_s1 + $0x10] sm:$0xff]  }
 0x1d9   : > { %2022 = vmatprep.mubr.msk.bf16.mxu0 %vm507_vm0, %v2229_v39 }
 0x1da   : > { %v740_v24 = vadd.f32 %v2475_v40, %v735_v6  ;;  %v2230_v40 = vld [vmem:[%s2918_s1 + $0x18] sm:$0xff]  }
 0x1db   : > { %2023 = vmatmul.mubr.msk.bf16.gmra.mrb[4].mxu0 %vm507_vm0, %v2230_v40 }
 0x1dc   : > { %741 = vst.msk [vmem:[#allocation2 + $0x8] sm:$0xff] %vm673_vm4, %v740_v24  ;;  %v742_v28 = vadd.f32 %v740_v24, %v667_v22  ;;  %2046 = vmatprep.mubr.msk.bf16.mxu0 %vm2298_vm1, %v2296_v33 }
 0x1de   : > { %v745_v29 = vpack.c.bf16 %v742_v28, %v742_v28 }
 0x1e0   : > { %v754_v37 = vsel %vm686_vm2, %v745_v29, 0 }
 0x1e1   : > { %2033 = vmatpush3.bf16.msra.mxu1 %v754_v37 }
 0x1e2   : > { %2038 = vmatprep.subr.bf16.mxu1 %v2296_v33 }
 0x1e4   : > { %2035 = vmatmul.mubr.msk.bf16.vlgmr.msra.gmra.mrb[4].mxu1 %vm682_vm3, %v1914_v38 }
 0x1e5   : > { %2040 = vmatprep.mubr.msk.bf16.mxu1 %vm2298_vm1, %v2296_v33 }
 0x2ae   : > { %v2024_v42 = vpop.f32.mrb[4].mxu0 }
 0x2b7   : > { %v790_v4 = vpop.f32.mrb[4].mxu1 }
 0x2b8   : > { %v791_v30 = vadd.f32 %v790_v4, %v2495_v54  ;;  %v2036_v31 = vpop.f32.mrb[5].mxu1  ;;  %v1916_v54 = vld [vmem:[%s2920_s3 + $0x8] sm:$0xf] }
 0x2b9   : > { %v793_v32 = vpop.f32.mrb[6].mxu1 }
 0x2ba   : > { %v796_v35 = vmax.f32 %v791_v30, 0.0  ;;  %v2037_v36 = vpop.f32.mrb[7].mxu1 }
 0x2bc   : > { %v801_v45 = vmul.f32 %v2481_v43, %v796_v35  ;;  %v570_v43 = vpop.f32.mrb[5].mxu0 }
 0x2bd   : > { %v571_v15 = vadd.f32 %v570_v43, %v2485_v46 }
 0x2be   : > { %v806_v9 = vadd.f32 %v2483_v44, %v801_v45  ;;  %v2584_v44 = vpop.f32.mrb[6].mxu0 }
 0x2bf   : > { %v573_v56 = vpop.f32.mrb[7].mxu0  ;;  %v589_v16 = vmax.f32 %v571_v15, 0.0 }
 0x2c0   : > { %807 = vst.msk [vmem:[#allocation2 + $0x10] sm:$0xff] %vm673_vm4, %v806_v9  ;;  %v808_v12 = vadd.f32 %v806_v9, %v668_v47 }
 0x2c1   : > { %v629_v24 = vmul.f32 %v2487_v48, %v589_v16  ;;  %v574_v48 = vadd.f32 %v573_v56, %v2493_v53 }
 0x2c2   : > { %v811_v41 = vpack.c.bf16 %v808_v12, %v808_v12 }
 0x2c3   : > { %v669_v38 = vadd.f32 %v2509_v61, %v629_v24 }
 0x2c4   : > { %v820_v7 = vsel %vm686_vm2, %v811_v41, 0 }
 0x2c5   : > { %2039 = vmatpush3.bf16.msra.mxu1 %v820_v7 }
 0x2c6   : > { %2050 = vmatprep.subr.bf16.mxu1 %v2296_v33 }
 0x2c8   : > { %2041 = vmatmul.mubr.msk.bf16.vlgmr.msra.gmra.mrb[8].mxu1 %vm682_vm3, %v1916_v54 }
 0x2c9   : > { %2052 = vmatprep.mubr.msk.bf16.mxu1 %vm2298_vm1, %v2296_v33 }
 0x39b   : > { %v856_v20 = vpop.f32.mrb[8].mxu1 }
 0x39c   : > { %v857_v21 = vadd.f32 %v856_v20, %v2503_v58  ;;  %v2042_v6 = vpop.f32.mrb[9].mxu1  ;;  %v1918_v58 = vld [vmem:[%s2920_s3 + $0xc] sm:$0xf]  ;;  %v1138_v20 = vld [vmem:[#allocation2] sm:$0xff] }
 0x39d   : > { %v859_v22 = vpop.f32.mrb[10].mxu1 }
 0x39e   : > { %v862_v28 = vmax.f32 %v857_v21, 0.0  ;;  %v2043_v29 = vpop.f32.mrb[11].mxu1 }
 0x39f   : > { %v2301_v29 = vmov 19  }
 0x3a0   : > { %v867_v37 = vmul.f32 %v2489_v49, %v862_v28  ;;  %v590_v49 = vmax.f32 %v574_v48, 0.0  ;;  %v2300_v28 = vmov 18   ;;  %2206 = vset.pattern.permute.xlu0 %v2301_v29 }
 0x3a1   : > { %2205 = vset.pattern.permute.xlu1 %v2300_v28  ;;  %1128 = vperm.xlu0 %2206, %v2399_v10  }
 0x3a2   : > { %v872_v39 = vadd.f32 %v2491_v51, %v867_v37  ;;  %v630_v30 = vmul.f32 %v2497_v55, %v590_v49  ;;  %v579_v55 = vadd.f32 %v2024_v42, %v2507_v60  ;;  %v1139_v60 = vld [vmem:[#allocation2 + $0x8] sm:$0xff]  ;;  %1077 = vperm.xlu1 %2205, %v2399_v10   ;;  %v2302_v37 = vmov 20  }
 0x3a3   : > { %v1146_v21 = vpack.c.bf16 %v1139_v60, %v1138_v20 }
 0x3a4   : > { %873 = vst.msk [vmem:[#allocation2 + $0x18] sm:$0xff] %vm673_vm4, %v872_v39  ;;  %v874_v40 = vadd.f32 %v872_v39, %v669_v38  ;;  %v670_v35 = vadd.f32 %v2517_v2, %v630_v30  ;;  %v582_v38 = vadd.f32 %v2584_v44, %v2523_v13  ;;  %v2674_v30 = vld [vmem:[%s2923_s6 + $0x18] sm:$0xff] }
 0x3a5   : > { %2209 = vset.pattern.permute.xlu0 %v2281_v3 }
 0x3a6   : > { %v877_v46 = vpack.c.bf16 %v874_v40, %v874_v40  ;;  %2207 = vset.pattern.permute.xlu1 %v2302_v37  ;;  %v592_v39 = vmax.f32 %v582_v38, 0.0 }
 0x3a7   : > { %1133 = vperm.xlu1 %2207, %v2399_v10  }
 0x3a8   : > { %v886_v50 = vsel %vm686_vm2, %v877_v46, 0  ;;  %v632_v48 = vmul.f32 %v2527_v19, %v592_v39  ;;  %v2231_v19 = vld [vmem:[%s2922_s5] sm:$0xff]  }
 0x3a9   : > { %2045 = vmatpush3.bf16.msra.mxu0 %v886_v50 }
 0x3aa   : > { %2056 = vmatprep.subr.bf16.mxu0 %v2296_v33 }
 0x3ab   : > { %v1141_v6 = vld [vmem:[#allocation2 + $0x18] sm:$0xff]  ;;  %2208 = vset.pattern.permute.xlu1 %v2281_v3 }
 0x3ac   : > { %2047 = vmatmul.mubr.msk.bf16.vlgmr.msra.gmra.mrb[8].mxu0 %vm682_vm3, %v1918_v58 }
 0x3ad   : > { %2058 = vmatprep.mubr.msk.bf16.mxu0 %vm2298_vm1, %v2296_v33 }
 0x47f   : > { %v922_v51 = vpop.f32.mrb[8].mxu0 }
 0x480   : > { %v923_v61 = vadd.f32 %v922_v51, %v2513_v63  ;;  %v2048_v52 = vpop.f32.mrb[9].mxu0  ;;  %v1920_v63 = vld [vmem:[%s2920_s3 + $0x10] sm:$0xf] }
 0x481   : > { %v925_v4 = vpop.f32.mrb[10].mxu0  ;;  %v672_v52 = vadd.f32 %v2543_v27, %v632_v48  ;;  %v2667_v27 = vld [vmem:[%s2923_s6 + $0x10] sm:$0xff] }
 0x482   : > { %v928_v31 = vmax.f32 %v923_v61, 0.0  ;;  %v2049_v32 = vpop.f32.mrb[11].mxu0 }
 0x483   : > { %v2698_v32 = vld [vmem:[%s2923_s6 + $0x28] sm:$0xff] }
 0x484   : > { %v933_v34 = vmul.f32 %v2501_v57, %v928_v31  ;;  %v591_v57 = vmax.f32 %v579_v55, 0.0  ;;  %v2685_v31 = vld [vmem:[%s2923_s6 + $0x20] sm:$0xff] }
 0x486   : > { %v938_v36 = vadd.f32 %v2505_v59, %v933_v34  ;;  %v631_v41 = vmul.f32 %v2511_v62, %v591_v57  ;;  %v1922_v62 = vld [vmem:[%s2920_s3 + $0x14] sm:$0xf] }
 0x487   : > { %v2705_v34 = vld [vmem:[%s2923_s6 + $0x30] sm:$0xff] }
 0x488   : > { %939 = vst.msk [vmem:[#allocation2 + $0x20] sm:$0xff] %vm673_vm4, %v938_v36  ;;  %v940_v45 = vadd.f32 %v938_v36, %v670_v35  ;;  %v671_v56 = vadd.f32 %v2525_v18, %v631_v41  ;;  %v2718_v35 = vld [vmem:[%s2923_s6 + $0x38] sm:$0xff]  ;;  %v1078_v36 = vpop.permute.xlu1 %1077 }
 0x48a   : > { %v943_v53 = vpack.c.bf16 %v940_v45, %v940_v45 }
 0x48c   : > { %v952_v47 = vsel %vm686_vm2, %v943_v53, 0 }
 0x48d   : > { %2051 = vmatpush3.bf16.msra.mxu1 %v952_v47 }
 0x48e   : > { %2062 = vmatprep.subr.bf16.mxu1 %v2296_v33 }
 0x48f   : > { %v1142_v22 = vld [vmem:[#allocation2 + $0x20] sm:$0xff] }
 0x490   : > { %2053 = vmatmul.mubr.msk.bf16.vlgmr.msra.gmra.mrb[12].mxu1 %vm682_vm3, %v1920_v63  ;;  %v1129_v63 = vpop.permute.xlu0 %1128 }
 0x491   : > { %2064 = vmatprep.mubr.msk.bf16.mxu1 %vm2298_vm1, %v2296_v33 }
 0x563   : > { %v988_v59 = vpop.f32.mrb[12].mxu1 }
 0x564   : > { %v989_v2 = vadd.f32 %v988_v59, %v2521_v11  ;;  %v2054_v9 = vpop.f32.mrb[13].mxu1 }
 0x565   : > { %v991_v12 = vpop.f32.mrb[14].mxu1 }
 0x566   : > { %v994_v7 = vmax.f32 %v989_v2, 0.0  ;;  %v2055_v54 = vpop.f32.mrb[15].mxu1  ;;  %v1134_v2 = vpop.permute.xlu1 %1133 }
 0x567   : > { %v2234_v54 = vld [vmem:[%s2922_s5 + $0x18] sm:$0xff]  }
 0x568   : > { %v999_v43 = vmul.f32 %v2515_v0, %v994_v7  ;;  %v1140_v0 = vld [vmem:[#allocation2 + $0x10] sm:$0xff] }
 0x569   : > { %v2233_v7 = vld [vmem:[%s2922_s5 + $0x10] sm:$0xff]  }
 0x56a   : > { %v1004_v15 = vadd.f32 %v2519_v5, %v999_v43  ;;  %v1147_v5 = vpack.c.bf16 %v1141_v6, %v1140_v0 }
 0x56c   : > { %1005 = vst.msk [vmem:[#allocation2 + $0x28] sm:$0xff] %vm673_vm4, %v1004_v15  ;;  %v1006_v16 = vadd.f32 %v1004_v15, %v671_v56 }
 0x56e   : > { %v1009_v42 = vpack.c.bf16 %v1006_v16, %v1006_v16 }
 0x570   : > { %v1018_v11 = vsel %vm686_vm2, %v1009_v42, 0 }
 0x571   : > { %2057 = vmatpush3.bf16.msra.mxu0 %v1018_v11 }
 0x572   : > { %2068 = vmatprep.subr.bf16.mxu0 %v1146_v21 }
 0x573   : > { %v1143_v18 = vld [vmem:[#allocation2 + $0x28] sm:$0xff] }
 0x574   : > { %2059 = vmatmul.mubr.msk.bf16.vlgmr.msra.gmra.mrb[12].mxu0 %vm682_vm3, %v1922_v62  ;;  %v1148_v24 = vpack.c.bf16 %v1143_v18, %v1142_v22 }
 0x575   : > { %2069 = vmatpush3.bf16.msra.mxu0 %v1146_v21  ;;  %2076 = vmatprep.mubr.msk.bf16.mxu0 %vm1210_vm5, %v2231_v19 }
 0x576   : > { %2070 = vmatprep.subr.bf16.mxu0 %v1147_v5 }
 0x579   : > { %2071 = vmatpush3.bf16.msra.mxu0 %v1147_v5 }
 0x57a   : > { %2072 = vmatprep.subr.bf16.mxu0 %v1148_v24 }
 0x57d   : > { %2073 = vmatpush3.bf16.msra.mxu0 %v1148_v24 }
 0x647   : > { %v1054_v40 = vpop.f32.mrb[12].mxu0 }
 0x648   : > { %v1055_v46 = vadd.f32 %v1054_v40, %v2535_v25  ;;  %v2060_v50 = vpop.f32.mrb[13].mxu0  ;;  %v1924_v25 = vld [vmem:[%s2920_s3 + $0x18] sm:$0xf] }
 0x649   : > { %v1057_v58 = vpop.f32.mrb[14].mxu0 }
 0x64a   : > { %v1060_v49 = vmax.f32 %v1055_v46, 0.0  ;;  %v2061_v51 = vpop.f32.mrb[15].mxu0 }
 0x64c   : > { %v1065_v61 = vmul.f32 %v2530_v23, %v1060_v49  ;;  %v2656_v23 = vld [vmem:[%s2923_s6] sm:$0xff] }
 0x64d   : > { %1152 = vperm.xlu1 %2208, %v2656_v23  }
 0x64e   : > { %v1070_v10 = vadd.f32 %v2541_v26, %v1065_v61  ;;  %v2662_v26 = vld [vmem:[%s2923_s6 + $0x8] sm:$0xff] }
 0x64f   : > { %1157 = vperm.xlu0 %2209, %v2662_v26  }
 0x650   : > { %1071 = vst.msk [vmem:[#allocation2 + $0x30] sm:$0xff] %vm673_vm4, %v1070_v10  ;;  %v1072_v4 = vadd.f32 %v1070_v10, %v672_v52 }
 0x651   : > { %1162 = vperm.xlu1 %2208, %v2667_v27  }
 0x652   : > { %v1075_v13 = vpack.c.bf16 %v1072_v4, %v1072_v4 }
 0x653   : > { %2210 = vset.pattern.permute.xlu0 %v2282_v8 }
 0x654   : > { %v1084_v44 = vsel %vm686_vm2, %v1075_v13, 0  ;;  %1297 = vperm.xlu0 %2210, %v2656_v23  }
 0x655   : > { %2063 = vmatpush3.bf16.msra.mxu1 %v1084_v44  ;;  %1167 = vperm.xlu1 %2208, %v2674_v30  }
 0x656   : > { %2084 = vmatprep.subr.bf16.mxu1 %v2296_v33 }
 0x657   : > { %v1144_v12 = vld [vmem:[#allocation2 + $0x30] sm:$0xff] }
 0x658   : > { %2065 = vmatmul.mubr.msk.bf16.vlgmr.msra.gmra.mrb[16].mxu1 %vm682_vm3, %v1924_v25  ;;  %1305 = vperm.xlu0 %2210, %v2667_v27  }
 0x659   : > { %2092 = vmatprep.mubr.msk.bf16.mxu1 %vm2298_vm1, %v2296_v33  ;;  %2211 = vset.pattern.permute.xlu1 %v2282_v8 }
 0x65a   : > { %1301 = vperm.xlu1 %2211, %v2662_v26  }
 0x65c   : > { %1313 = vperm.xlu0 %2210, %v2685_v31  }
 0x65e   : > { %2212 = vset.pattern.permute.xlu1 %v2280_v1 }
 0x65f   : > { %1337 = vperm.xlu1 %2212, %v2656_v23  }
 0x660   : > { %2217 = vset.pattern.permute.xlu0 %v2280_v1 }
 0x661   : > { %1341 = vperm.xlu0 %2217, %v2662_v26  }
 0x663   : > { %2213 = vset.pattern.permute.xlu1 %v2281_v3 }
 0x664   : > { %1172 = vperm.xlu1 %2213, %v2685_v31  }
 0x665   : > { %1349 = vperm.xlu0 %2217, %v2674_v30  }
 0x668   : > { %1177 = vperm.xlu1 %2213, %v2698_v32  }
 0x669   : > { %1357 = vperm.xlu0 %2217, %v2698_v32  }
 0x66c   : > { %2214 = vset.pattern.permute.xlu1 %v2282_v8 }
 0x66d   : > { %1361 = vperm.xlu0 %2217, %v2705_v34   ;;  %1309 = vperm.xlu1 %2214, %v2674_v30  }
 0x671   : > { %2223 = vset.pattern.permute.xlu0 %v2281_v3  ;;  %2215 = vset.pattern.permute.xlu1 %v2280_v1 }
 0x672   : > { %1345 = vperm.xlu1 %2215, %v2667_v27  }
 0x676   : > { %2216 = vset.pattern.permute.xlu1 %v2281_v3 }
 0x677   : > { %1182 = vperm.xlu1 %2216, %v2705_v34  }
 0x67b   : > { %1187 = vperm.xlu1 %2216, %v2718_v35  }
 0x67f   : > { %2218 = vset.pattern.permute.xlu1 %v2282_v8 }
 0x680   : > { %1317 = vperm.xlu1 %2218, %v2698_v32  }
 0x684   : > { %2219 = vset.pattern.permute.xlu1 %v2280_v1 }
 0x685   : > { %1353 = vperm.xlu1 %2219, %v2685_v31  }
 0x689   : > { %2220 = vset.pattern.permute.xlu1 %v2282_v8 }
 0x68a   : > { %1321 = vperm.xlu1 %2220, %v2705_v34  }
 0x68e   : > { %1325 = vperm.xlu1 %2220, %v2718_v35  }
 0x692   : > { %2221 = vset.pattern.permute.xlu1 %v2280_v1 }
 0x693   : > { %1365 = vperm.xlu1 %2221, %v2718_v35  }
 0x697   : > { %2222 = vset.pattern.permute.xlu1 %v2281_v3  ;;  %v2232_v3 = vld [vmem:[%s2922_s5 + $0x8] sm:$0xff]  }
 0x6cc   : > { %v1153_v43 = vpop.permute.xlu1 %1152 }
 0x6ce   : > { %v1158_v21 = vpop.permute.xlu0 %1157 }
 0x6d0   : > { %v1163_v56 = vpop.permute.xlu1 %1162 }
 0x6d3   : > { %v1298_v6 = vpop.permute.xlu0 %1297 }
 0x6d4   : > { %v1168_v15 = vpop.permute.xlu1 %1167 }
 0x6d7   : > { %v1306_v5 = vpop.permute.xlu0 %1305 }
 0x6d9   : > { %v1302_v16 = vpop.permute.xlu1 %1301 }
 0x6db   : > { %v1314_v22 = vpop.permute.xlu0 %1313 }
 0x6de   : > { %v1338_v60 = vpop.permute.xlu1 %1337 }
 0x6e0   : > { %v1342_v28 = vpop.permute.xlu0 %1341 }
 0x6e3   : > { %v1173_v42 = vpop.permute.xlu1 %1172 }
 0x6e4   : > { %v1350_v10 = vpop.permute.xlu0 %1349 }
 0x6e7   : > { %v1178_v20 = vpop.permute.xlu1 %1177 }
 0x6ec   : > { %v1310_v11 = vpop.permute.xlu1 %1309 }
 0x6f1   : > { %v1346_v62 = vpop.permute.xlu1 %1345 }
 0x6f6   : > { %v1183_v0 = vpop.permute.xlu1 %1182 }
 0x6fa   : > { %v1188_v18 = vpop.permute.xlu1 %1187 }
 0x6ff   : > { %v1318_v24 = vpop.permute.xlu1 %1317 }
 0x704   : > { %v1354_v39 = vpop.permute.xlu1 %1353 }
 0x709   : > { %v1322_v44 = vpop.permute.xlu1 %1321 }
 0x72b   : > { %v1120_v45 = vpop.f32.mrb[16].mxu1 }
 0x72c   : > { %v1121_v53 = vadd.f32 %v1120_v45, %v1078_v36  ;;  %v2066_v47 = vpop.f32.mrb[17].mxu1 }
 0x72d   : > { %v1123_v55 = vpop.f32.mrb[18].mxu1 }
 0x72e   : > { %v1126_v57 = vmax.f32 %v1121_v53, 0.0  ;;  %v2067_v59 = vpop.f32.mrb[19].mxu1 }
 0x730   : > { %v1131_v8 = vmul.f32 %v1129_v63, %v1126_v57 }
 0x732   : > { %v1136_v9 = vadd.f32 %v1134_v2, %v1131_v8 }
 0x734   : > { %1137 = vst.msk [vmem:[#allocation2 + $0x38] sm:$0xff] %vm673_vm4, %v1136_v9  ;;  %v1358_v9 = vpop.permute.xlu0 %1357 }
 0x73b   : > { %v1145_v41 = vld [vmem:[#allocation2 + $0x38] sm:$0xff] }
 0x73c   : > { %v1149_v1 = vpack.c.bf16 %v1145_v41, %v1144_v12 }
 0x73e   : > { %2074 = vmatprep.subr.bf16.mxu0 %v1149_v1 }
 0x73f   : > { %2075 = vmatpush3.bf16.msra.mxu0 %v1149_v1 }
 0x742   : > { %2077 = vmatmul.mubr.msk.bf16.vlgmr.msra.gmra.mrb[16].mxu0 %vm1210_vm5, %v2232_v3 }
 0x743   : > { %2080 = vmatprep.mubr.msk.bf16.mxu0 %vm1210_vm5, %v2233_v7 }
 0x74a   : > { %2081 = vmatmul.mubr.msk.bf16.gmra.mrb[20].mxu0 %vm1210_vm5, %v2234_v54 }
 0x815   : > { %v2078_v29 = vpop.f32.mrb[16].mxu0 }
 0x816   : > { %v1266_v37 = vadd.f32 %v2078_v29, %v1163_v56  ;;  %v1257_v38 = vpop.f32.mrb[17].mxu0 }
 0x817   : > { %v1258_v40 = vadd.f32 %v1257_v38, %v1153_v43  ;;  %v2079_v46 = vpop.f32.mrb[18].mxu0  ;;  %v1326_v43 = vpop.permute.xlu1 %1325  ;;  %v404_v38 = vld [vmem:[%s2926_s9] sm:$0xff] }
 0x818   : > { %v1290_v50 = vmax.f32 %v1266_v37, 0.0  ;;  %v1269_v58 = vadd.f32 %v2079_v46, %v1168_v15  ;;  %v1260_v48 = vpop.f32.mrb[19].mxu0 }
 0x819   : > { %v1288_v49 = vmax.f32 %v1258_v40, 0.0  ;;  %v1261_v51 = vadd.f32 %v1260_v48, %v1158_v21 }
 0x81a   : > { %v1330_v61 = vmul.f32 %v1306_v5, %v1290_v50  ;;  %v1291_v52 = vmax.f32 %v1269_v58, 0.0 }
 0x81b   : > { %v1328_v4 = vmul.f32 %v1298_v6, %v1288_v49  ;;  %v1289_v13 = vmax.f32 %v1261_v51, 0.0 }
 0x81c   : > { %v1331_v45 = vmul.f32 %v1310_v11, %v1291_v52  ;;  %v2746_v63 = vadd.f32 %v1346_v62, %v1330_v61  ;;  %v1362_v62 = vpop.permute.xlu0 %1361 }
 0x81d   : > { %v1329_v25 = vmul.f32 %v1302_v16, %v1289_v13  ;;  %v2082_v19 = vpop.f32.mrb[20].mxu0  ;;  %v2744_v36 = vadd.f32 %v1338_v60, %v1328_v4  ;;  %v2235_v4 = vld [vmem:[%s2924_s7] sm:$0xff]  }
 0x81e   : > { %v1282_v53 = vadd.f32 %v2082_v19, %v1183_v0  ;;  %v1273_v47 = vpop.f32.mrb[21].mxu0  ;;  %v2754_v54 = vadd.f32 %v1350_v10, %v1331_v45  ;;  %v1382_v56 = vsel %vm673_vm4, %v2746_v63, 0.0  ;;  %v2236_v13 = vld [vmem:[%s2925_s8] sm:$0xff]   ;;  %v1663_v45 = vld [vmem:[%s2389_s28 + $0x18] sm:$0xff] }
 0x81f   : > { %v1274_v55 = vadd.f32 %v1273_v47, %v1173_v42  ;;  %v2083_v57 = vpop.f32.mrb[22].mxu0  ;;  %v1376_v59 = vsel %vm673_vm4, %v2744_v36, 0.0  ;;  %v2750_v2 = vadd.f32 %v1342_v28, %v1329_v25  ;;  %v1661_v25 = vld [vmem:[%s2389_s28 + $0x8] sm:$0xff]  ;;  %v433_v47 = vld [vmem:[%s2927_s10] sm:$0xff] }
 0x820   : > { %v1294_v8 = vmax.f32 %v1282_v53, 0.0  ;;  %v1285_v12 = vadd.f32 %v2083_v57, %v1188_v18  ;;  %v1276_v41 = vpop.f32.mrb[23].mxu0  ;;  %1377 = vadd.xlane.f32.xlu0 %v1376_v59  ;;  %2114 = vmatprep.mubr.msk.f32.mxu0 %vm507_vm0, %v433_v47  ;;  %v435_v57 = vld [vmem:[%s2927_s10 + $0x10] sm:$0xff]  ;;  %v436_v59 = vld [vmem:[%s2927_s10 + $0x18] sm:$0xff] }
 0x821   : > { %v1292_v1 = vmax.f32 %v1274_v55, 0.0  ;;  %v1277_v3 = vadd.f32 %v1276_v41, %v1178_v20  ;;  %v1379_v7 = vsel %vm673_vm4, %v2750_v2, 0.0  ;;  %v1385_v20 = vsel %vm673_vm4, %v2754_v54, 0.0  ;;  %v434_v55 = vld [vmem:[%s2927_s10 + $0x8] sm:$0xff]  ;;  %v440_v41 = vld [vmem:[%s2927_s10 + $0x38] sm:$0xff] }
 0x822   : > { %1380 = vadd.xlane.f32.xlu1 %v1379_v7  ;;  %v1295_v16 = vmax.f32 %v1285_v12, 0.0  ;;  %v1334_v42 = vmul.f32 %v1322_v44, %v1294_v8  ;;  %v1660_v44 = vld [vmem:[%s2389_s28] sm:$0xff]  ;;  %v439_v12 = vld [vmem:[%s2927_s10 + $0x30] sm:$0xff] }
 0x823   : > { %v1332_v15 = vmul.f32 %v1314_v22, %v1292_v1  ;;  %v1293_v60 = vmax.f32 %v1277_v3, 0.0  ;;  %v1366_v22 = vpop.permute.xlu1 %1365  ;;  %v2126_v19 = vpack.c.bf16 %v1661_v25, %v1660_v44  ;;  %v437_v8 = vld [vmem:[%s2927_s10 + $0x20] sm:$0xff] }
 0x824   : > { %1383 = vadd.xlane.f32.xlu0 %v1382_v56  ;;  %v1335_v6 = vmul.f32 %v1326_v43, %v1295_v16  ;;  %v2762_v0 = vadd.f32 %v1362_v62, %v1334_v42 }
 0x825   : > { %v1333_v11 = vmul.f32 %v1318_v24, %v1293_v60  ;;  %v2758_v21 = vadd.f32 %v1354_v39, %v1332_v15  ;;  %v405_v39 = vld [vmem:[%s2926_s9 + $0x8] sm:$0xff]  ;;  %2127 = vmatprep.subr.bf16.mxu0 %v2126_v19 }
 0x826   : > { %v2768_v28 = vadd.f32 %v1366_v22, %v1335_v6  ;;  %v1394_v24 = vsel %vm673_vm4, %v2762_v0, 0.0  ;;  %2129 = vmatpush3.bf16.msra.mxu0 %v2126_v19  ;;  %v2238_v6 = vld [vmem:[%s2925_s8 + $0x10] sm:$0xff]  }
 0x827   : > { %v1388_v5 = vsel %vm673_vm4, %v2758_v21, 0.0  ;;  %v2766_v18 = vadd.f32 %v1358_v9, %v1333_v11  ;;  %v438_v9 = vld [vmem:[%s2927_s10 + $0x28] sm:$0xff] }
 0x828   : > { %1389 = vadd.xlane.f32.xlu1 %v1388_v5  ;;  %1386 = vadd.xlane.f32.xlu0 %v1385_v20  ;;  %v1397_v37 = vsel %vm673_vm4, %v2768_v28, 0.0  ;;  %v2237_v20 = vld [vmem:[%s2925_s8 + $0x8] sm:$0xff]   ;;  %v2239_v5 = vld [vmem:[%s2925_s8 + $0x18] sm:$0xff]  }
 0x829   : > { %v1391_v29 = vsel %vm673_vm4, %v2766_v18, 0.0 }
 0x82c   : > { %1395 = vadd.xlane.f32.xlu1 %v1394_v24  ;;  %1392 = vadd.xlane.f32.xlu0 %v1391_v29 }
 0x830   : > { %1398 = vadd.xlane.f32.xlu0 %v1397_v37 }
 0x83d   : > { %1415 = vperm.xlu1 %2222, %v404_v38  }
 0x841   : > { %2224 = vset.pattern.permute.xlu1 %v2283_v14 }
 0x842   : > { %1476 = vperm.xlu1 %2224, %v2656_v23  }
 0x846   : > { %1420 = vperm.xlu0 %2223, %v405_v39   ;;  %1480 = vperm.xlu1 %2224, %v2662_v26  }
 0x84a   : > { %2225 = vset.pattern.permute.xlu0 %v2285_v17  ;;  %1484 = vperm.xlu1 %2224, %v2667_v27  }
 0x84b   : > { %1665 = vperm.xlu0 %2225, %v2656_v23  }
 0x84e   : > { %1488 = vperm.xlu1 %2224, %v2674_v30  }
 0x84f   : > { %1677 = vperm.xlu0 %2225, %v2674_v30  }
 0x852   : > { %1492 = vperm.xlu1 %2224, %v2685_v31  }
 0x853   : > { %1685 = vperm.xlu0 %2225, %v2698_v32  }
 0x856   : > { %1496 = vperm.xlu1 %2224, %v2698_v32  }
 0x857   : > { %1693 = vperm.xlu0 %2225, %v2718_v35  }
 0x85a   : > { %1500 = vperm.xlu1 %2224, %v2705_v34  }
 0x85e   : > { %1504 = vperm.xlu1 %2224, %v2718_v35  }
 0x862   : > { %2226 = vset.pattern.permute.xlu1 %v2285_v17 }
 0x863   : > { %1669 = vperm.xlu1 %2226, %v2662_v26  }
 0x867   : > { %1673 = vperm.xlu1 %2226, %v2667_v27  }
 0x86b   : > { %1681 = vperm.xlu1 %2226, %v2685_v31  }
 0x86f   : > { %1689 = vperm.xlu1 %2226, %v2705_v34  }
 0x8ad   : > { %v1378_v14 = vpop.xlane.xlu0 %1377 }
 0x8ae   : > { %v1401_v30 = vmul.f32 0.0625, %v1378_v14 }
 0x8af   : > { %v1381_v23 = vpop.xlane.xlu1 %1380 }
 0x8b0   : > { %v1402_v40 = vmul.f32 0.0625, %v1381_v23 }
 0x8b1   : > { %v1384_v46 = vpop.xlane.xlu0 %1383 }
 0x8b2   : > { %v1409_v32 = vpack.c.bf16 %v1402_v40, %v1401_v30  ;;  %v1403_v17 = vmul.f32 0.0625, %v1384_v46 }
 0x8b4   : > { %2085 = vmatpush3.bf16.msra.mxu1 %v1409_v32 }
 0x8b5   : > { %v1390_v50 = vpop.xlane.xlu1 %1389  ;;  %v1387_v58 = vpop.xlane.xlu0 %1386  ;;  %2086 = vmatprep.subr.bf16.mxu1 %v2296_v33 }
 0x8b6   : > { %v1404_v35 = vmul.f32 0.0625, %v1387_v58  ;;  %v1405_v27 = vmul.f32 0.0625, %v1390_v50 }
 0x8b8   : > { %v1410_v26 = vpack.c.bf16 %v1404_v35, %v1403_v17 }
 0x8b9   : > { %v1393_v48 = vpop.xlane.xlu0 %1392  ;;  %v1396_v31 = vpop.xlane.xlu1 %1395 }
 0x8ba   : > { %v1406_v49 = vmul.f32 0.0625, %v1393_v48  ;;  %2087 = vmatpush3.bf16.msra.mxu1 %v1410_v26  ;;  %v1407_v61 = vmul.f32 0.0625, %v1396_v31 }
 0x8bb   : > { %2088 = vmatprep.subr.bf16.mxu1 %v2296_v33 }
 0x8bc   : > { %v1411_v34 = vpack.c.bf16 %v1406_v49, %v1405_v27 }
 0x8bd   : > { %v1399_v51 = vpop.xlane.xlu0 %1398  ;;  %v1416_v1 = vpop.permute.xlu1 %1415 }
 0x8be   : > { %v1408_v52 = vmul.f32 0.0625, %v1399_v51  ;;  %2089 = vmatpush3.bf16.msra.mxu1 %v1411_v34 }
 0x8bf   : > { %2090 = vmatprep.subr.bf16.mxu1 %v2296_v33  ;;  %v1662_v33 = vld [vmem:[%s2389_s28 + $0x10] sm:$0xff] }
 0x8c0   : > { %v1412_v10 = vpack.c.bf16 %v1408_v52, %v1407_v61  ;;  %v2130_v53 = vpack.c.bf16 %v1663_v45, %v1662_v33 }
 0x8c1   : > { %v1477_v30 = vpop.permute.xlu1 %1476 }
 0x8c2   : > { %2091 = vmatpush3.bf16.msra.mxu1 %v1412_v10  ;;  %2131 = vmatprep.subr.bf16.mxu0 %v2130_v53 }
 0x8c3   : > { %2133 = vmatpush3.bf16.msra.mxu0 %v2130_v53 }
 0x8c5   : > { %2093 = vmatmul.mubr.msk.bf16.vlgmr.msra.gmra.mrb[20].mxu1 %vm1210_vm5, %v2235_v4  ;;  %v1421_v7 = vpop.permute.xlu0 %1420  ;;  %v1481_v40 = vpop.permute.xlu1 %1480 }
 0x8c6   : > { %2098 = vmatprep.mubr.msk.bf16.mxu1 %vm673_vm4, %v2236_v13  ;;  %2115 = vmatmul.mubr.msk.f32.vlgmr.msra.gmra.mrb[24].mxu0 %vm507_vm0, %v434_v55 }
 0x8c7   : > { %2117 = vmatprep.mubr.msk.f32.mxu0 %vm507_vm0, %v435_v57 }
 0x8c9   : > { %v1485_v46 = vpop.permute.xlu1 %1484 }
 0x8ca   : > { %2118 = vmatmul.mubr.msk.f32.gmra.mrb[26].mxu0 %vm507_vm0, %v436_v59 }
 0x8cb   : > { %2120 = vmatprep.mubr.msk.f32.mxu0 %vm507_vm0, %v437_v8 }
 0x8cd   : > { %v1489_v32 = vpop.permute.xlu1 %1488 }
 0x8ce   : > { %2121 = vmatmul.mubr.msk.f32.gmra.mrb[28].mxu0 %vm507_vm0, %v438_v9 }
 0x8cf   : > { %2123 = vmatprep.mubr.msk.f32.mxu0 %vm507_vm0, %v439_v12 }
 0x8d1   : > { %v1493_v50 = vpop.permute.xlu1 %1492 }
 0x8d2   : > { %2124 = vmatmul.mubr.msk.f32.gmra.mrb[30].mxu0 %vm507_vm0, %v440_v41 }
 0x8d5   : > { %v1497_v58 = vpop.permute.xlu1 %1496 }
 0x8d9   : > { %v1501_v51 = vpop.permute.xlu1 %1500 }
 0x8dd   : > { %v1505_v19 = vpop.permute.xlu1 %1504 }
 0x998   : > { %v1465_v3 = vpop.f32.mrb[20].mxu1 }
 0x999   : > { %v2094_v43 = vpop.f32.mrb[21].mxu1  ;;  %v1466_v56 = vadd.f32 %v1465_v3, %v1416_v1  ;;  %v2860_v22 = vpop.f32.mrb[24].mxu0 }
 0x99a   : > { %v1468_v15 = vpop.f32.mrb[22].mxu1  ;;  %v2862_v24 = vpop.f32.mrb[25].mxu0 }
 0x99b   : > { %v1469_v16 = vadd.f32 %v1468_v15, %v1421_v7  ;;  %v2095_v60 = vpop.f32.mrb[23].mxu1  ;;  %v1472_v42 = vmax.f32 %v1466_v56, 0.0  ;;  %v1670_v3 = vpop.permute.xlu1 %1669 }
 0x99d   : > { %v1473_v11 = vmax.f32 %v1469_v16, 0.0  ;;  %v2864_v29 = vpop.f32.mrb[26].mxu0  ;;  %v1666_v16 = vpop.permute.xlu0 %1665 }
 0x99e   : > { %v2866_v37 = vpop.f32.mrb[27].mxu0 }
 0x99f   : > { %v1474_v62 = vpack.c.bf16 %v1473_v11, %v1472_v42  ;;  %v1674_v42 = vpop.permute.xlu1 %1673 }
 0x9a1   : > { %2096 = vmatprep.subr.bf16.mxu1 %v1474_v62  ;;  %v2868_v38 = vpop.f32.mrb[28].mxu0 }
 0x9a2   : > { %2097 = vmatpush3.bf16.msra.mxu1 %v1474_v62  ;;  %v2870_v39 = vpop.f32.mrb[29].mxu0 }
 0x9a5   : > { %2099 = vmatmul.mubr.msk.bf16.vlgmr.msra.gmra.mrb[24].mxu1 %vm673_vm4, %v2237_v20  ;;  %v2872_v14 = vpop.f32.mrb[30].mxu0 }
 0x9a6   : > { %2102 = vmatprep.mubr.msk.bf16.mxu1 %vm673_vm4, %v2238_v6  ;;  %v2874_v23 = vpop.f32.mrb[31].mxu0  ;;  %v1678_v6 = vpop.permute.xlu0 %1677 }
 0x9ad   : > { %2103 = vmatmul.mubr.msk.bf16.gmra.mrb[28].mxu1 %vm673_vm4, %v2239_v5 }
 0xa78   : > { %v2100_v17 = vpop.f32.mrb[24].mxu1 }
 0xa79   : > { %v1582_v35 = vadd.f32 %v2100_v17, %v1485_v46  ;;  %v1573_v26 = vpop.f32.mrb[25].mxu1  ;;  %v1682_v17 = vpop.permute.xlu1 %1681 }
 0xa7a   : > { %v1574_v48 = vadd.f32 %v1573_v26, %v1477_v30  ;;  %v2101_v27 = vpop.f32.mrb[26].mxu1 }
 0xa7b   : > { %v1946_v49 = vmul.f32 -1.442695, %v1582_v35  ;;  %v1585_v31 = vadd.f32 %v2101_v27, %v1489_v32  ;;  %v1576_v34 = vpop.f32.mrb[27].mxu1 }
 0xa7c   : > { %v1944_v61 = vmul.f32 -1.442695, %v1574_v48  ;;  %v1577_v52 = vadd.f32 %v1576_v34, %v1481_v40 }
 0xa7d   : > { %2240 = vpow2.f32 %v1946_v49  ;;  %v1947_v10 = vmul.f32 -1.442695, %v1585_v31  ;;  %v1686_v49 = vpop.permute.xlu0 %1685 }
 0xa7e   : > { %2242 = vpow2.f32 %v1944_v61  ;;  %v1945_v4 = vmul.f32 -1.442695, %v1577_v52  ;;  %v1792_v52 = vadd.f32 %v2860_v22, %v1670_v3 }
 0xa7f   : > { %2244 = vpow2.f32 %v1947_v10 }
 0xa80   : > { %2246 = vpow2.f32 %v1945_v4  ;;  %v2104_v13 = vpop.f32.mrb[28].mxu1 }
 0xa81   : > { %v1598_v44 = vadd.f32 %v2104_v13, %v1501_v51  ;;  %v1589_v25 = vpop.f32.mrb[29].mxu1 }
 0xa82   : > { %v1590_v33 = vadd.f32 %v1589_v25, %v1493_v50  ;;  %v2105_v45 = vpop.f32.mrb[30].mxu1  ;;  %v1797_v50 = vadd.f32 %v2866_v37, %v1674_v42  ;;  %v1787_v37 = vadd.f32 %v2862_v24, %v1666_v16 }
 0xa83   : > { %v1950_v53 = vmul.f32 -1.442695, %v1598_v44  ;;  %v1601_v47 = vadd.f32 %v2105_v45, %v1505_v19  ;;  %v1592_v55 = vpop.f32.mrb[31].mxu1  ;;  %v1807_v19 = vadd.f32 %v2870_v39, %v1682_v17 }
 0xa84   : > { %v1948_v57 = vmul.f32 -1.442695, %v1590_v33  ;;  %v1593_v59 = vadd.f32 %v1592_v55, %v1497_v58 }
 0xa85   : > { %2248 = vpow2.f32 %v1950_v53  ;;  %v1951_v8 = vmul.f32 -1.442695, %v1601_v47 }
 0xa86   : > { %2250 = vpow2.f32 %v1948_v57  ;;  %v1949_v9 = vmul.f32 -1.442695, %v1593_v59 }
 0xa87   : > { %v2241_v12 = vpop.eup %2240  ;;  %2252 = vpow2.f32 %v1951_v8 }
 0xa88   : > { %v2243_v41 = vpop.eup %2242  ;;  %v1630_v1 = vadd.f32 1.0, %v2241_v12  ;;  %2254 = vpow2.f32 %v1949_v9 }
 0xa89   : > { %v2245_v7 = vpop.eup %2244  ;;  %v1628_v43 = vadd.f32 1.0, %v2243_v41 }
 0xa8a   : > { %v2247_v56 = vpop.eup %2246  ;;  %2256 = vrcp.f32 %v1630_v1  ;;  %v1631_v15 = vadd.f32 1.0, %v2245_v7 }
 0xa8b   : > { %2258 = vrcp.f32 %v1628_v43  ;;  %v1629_v60 = vadd.f32 1.0, %v2247_v56 }
 0xa8c   : > { %2260 = vrcp.f32 %v1631_v15 }
 0xa8d   : > { %2262 = vrcp.f32 %v1629_v60 }
 0xa8f   : > { %v2249_v11 = vpop.eup %2248 }
 0xa90   : > { %v2251_v62 = vpop.eup %2250  ;;  %v1634_v20 = vadd.f32 1.0, %v2249_v11 }
 0xa91   : > { %v2253_v5 = vpop.eup %2252  ;;  %v1632_v30 = vadd.f32 1.0, %v2251_v62 }
 0xa92   : > { %v2255_v40 = vpop.eup %2254  ;;  %2264 = vrcp.f32 %v1634_v20  ;;  %v1635_v46 = vadd.f32 1.0, %v2253_v5 }
 0xa93   : > { %2266 = vrcp.f32 %v1632_v30  ;;  %v1633_v32 = vadd.f32 1.0, %v2255_v40 }
 0xa94   : > { %v2257_v58 = vpop.eup %2256  ;;  %2268 = vrcp.f32 %v1635_v46 }
 0xa95   : > { %v2259_v35 = vpop.eup %2258  ;;  %2270 = vrcp.f32 %v1633_v32  ;;  %v1654_v26 = vmul.f32 %v2257_v58, %v2746_v63  ;;  %v1802_v63 = vadd.f32 %v2864_v29, %v1678_v6 }
 0xa96   : > { %v2261_v48 = vpop.eup %2260  ;;  %v1652_v27 = vmul.f32 %v2259_v35, %v2744_v36  ;;  %v1690_v36 = vpop.permute.xlu1 %1689 }
 0xa97   : > { %v2263_v31 = vpop.eup %2262  ;;  %v1827_v34 = vadd.f32 %v1797_v50, %v1654_v26  ;;  %v1655_v51 = vmul.f32 %v2261_v48, %v2754_v54  ;;  %v1694_v54 = vpop.permute.xlu0 %1693  ;;  %v1817_v22 = vadd.f32 %v2874_v23, %v1690_v36 }
 0xa98   : > { %v1653_v61 = vmul.f32 %v2263_v31, %v2750_v2  ;;  %v1825_v10 = vadd.f32 %v1787_v37, %v1652_v27  ;;  %v1822_v47 = vadd.f32 %v2872_v14, %v1694_v54 }
 0xa99   : > { %1835 = vst.msk [vmem:[%s2882_s21 + $0x10] sm:$0xff] %vm673_vm4, %v1827_v34  ;;  %v1828_v4 = vadd.f32 %v1802_v63, %v1655_v51 }
 0xa9a   : > { %v1826_v13 = vadd.f32 %v1792_v52, %v1653_v61  ;;  %1833 = vst.msk [vmem:[%s2882_s21] sm:$0xff] %vm673_vm4, %v1825_v10 }
 0xa9b   : > { %1836 = vst.msk [vmem:[%s2882_s21 + $0x18] sm:$0xff] %vm673_vm4, %v1828_v4 }
 0xa9c   : > { %v2265_v24 = vpop.eup %2264  ;;  %1834 = vst.msk [vmem:[%s2882_s21 + $0x8] sm:$0xff] %vm673_vm4, %v1826_v13 }
 0xa9d   : > { %v2267_v29 = vpop.eup %2266  ;;  %v1658_v2 = vmul.f32 %v2265_v24, %v2762_v0  ;;  %v1812_v0 = vadd.f32 %v2868_v38, %v1686_v49 }
 0xa9e   : > { %v2269_v44 = vpop.eup %2268  ;;  %v1656_v25 = vmul.f32 %v2267_v29, %v2758_v21 }
 0xa9f   : > { %v2271_v33 = vpop.eup %2270  ;;  %v1831_v45 = vadd.f32 %v1817_v22, %v1658_v2  ;;  %v1659_v53 = vmul.f32 %v2269_v44, %v2768_v28 }
 0xaa0   : > { %v1829_v55 = vadd.f32 %v1807_v19, %v1656_v25  ;;  %v1657_v57 = vmul.f32 %v2271_v33, %v2766_v18 }
 0xaa1   : > { %1839 = vst.msk [vmem:[%s2882_s21 + $0x30] sm:$0xff] %vm673_vm4, %v1831_v45  ;;  %v1832_v23 = vadd.f32 %v1822_v47, %v1659_v53 }
 0xaa2   : > { %1837 = vst.msk [vmem:[%s2882_s21 + $0x20] sm:$0xff] %vm673_vm4, %v1829_v55  ;;  %v1830_v59 = vadd.f32 %v1812_v0, %v1657_v57 }
 0xaa3   : > { %1840 = vst.msk [vmem:[%s2882_s21 + $0x38] sm:$0xff] %vm673_vm4, %v1832_v23 }
 0xaa4   : > { %1838 = vst.msk [vmem:[%s2882_s21 + $0x28] sm:$0xff] %vm673_vm4, %v1830_v59 }
 0xaa5 PF: > { %s21_s17 = sadd.s32 1, %s2278_s17  }
 0xaa6   : > { %p18_p4 = scmp.ge.s32.totalorder %s21_s17, 4  }
 0xaa8   :  { %20 = sbr.rel (!%p18_p4) target bundleno = 1 (0x1), region = 100 }

</bundles_post_ra>
